<compile_context>
chip_gen: v7x
topology: tpu7x:2x2x1
jax: 0.10.0
libtpu: 0.0.40
codegen_flags: <defaults>
</compile_context>

<pallas_src>
import math
import functools

import jax
import jax.numpy as jnp
from jax.experimental import pallas as pl
from jax.experimental.pallas import tpu as pltpu

_INV_SQRT2 = 1.0 / math.sqrt(2.0)


def _round_up(x, m):
    return ((x + m - 1) // m) * m


def _intermediate_kernel(x_ref, w_ref, b_ref, o_ref, *, mm_dtype,
                         approximate_gelu):
    # x_ref: (TM, H) input dtype   w_ref: (H, TN) mm_dtype (pre-cast once)
    # b_ref: (1, TN) f32           o_ref: (TM, TN) out dtype
    x = x_ref[...].astype(mm_dtype)       # in-kernel cast, hidden under MXU
    acc = jnp.dot(x, w_ref[...], preferred_element_type=jnp.float32)
    acc = acc + b_ref[...]
    if approximate_gelu:
        # Cheaper epilogue (tanh lands on the EUP slot); changes numerics vs
        # HF's exact erf "gelu" -- gated behind a flag.
        act = jax.nn.gelu(acc, approximate=True)
    else:
        # Exact erf-based GELU, matching HF ACT2FN["gelu"].
        act = 0.5 * acc * (1.0 + jax.lax.erf(acc * _INV_SQRT2))
    o_ref[...] = act.astype(o_ref.dtype)


def _supports_single_buffering():
    if not hasattr(pl, "Buffered"):
        return False
    try:
        pl.BlockSpec((8, 128), lambda i: (0, 0), pipeline_mode=pl.Buffered(1))
    except Exception:
        return False
    return True


_SINGLE_BUFFER_OK = _supports_single_buffering()


def _const_spec(shape, index_map):
    """BlockSpec for a block whose index never changes (VMEM-resident)."""
    if _SINGLE_BUFFER_OK:
        return pl.BlockSpec(shape, index_map, pipeline_mode=pl.Buffered(1))
    return pl.BlockSpec(shape, index_map)


def _vmem_capacity_bytes():
    try:
        return int(pltpu.get_tpu_info().vmem_capacity_bytes)
    except Exception:
        return 64 << 20          # conservative: v7x physical VMEM


def _derive_tiles(M, H, I, x_isize, w_isize, out_isize, tile_m_max):
    """Chip-VMEM-aware tile selection.  Prefers a fully resident weight."""
    capacity = _vmem_capacity_bytes()
    budget = max(int(0.7 * capacity), 24 << 20)
    w_buf = 1 if _SINGLE_BUFFER_OK else 2

    def need(tm, tn, resident):
        wb = w_buf if resident else 2
        return (2 * tm * H * x_isize          # activations, double-buffered
                + wb * H * tn * w_isize       # weight slab
                + 2 * tn * 4                  # bias row
                + 2 * tm * tn * out_isize)    # output tile, double-buffered

    tile_m0 = max(16, min(tile_m_max, _round_up(M, 16)))
    # Give v7x's two TensorCores at least two M tiles to split.
    if pl.cdiv(M, tile_m0) < 2 and M > 32:
        tile_m0 = max(16, _round_up(pl.cdiv(M, 2), 16))

    # Preferred: weight fully resident, 1-D grid over M tiles only.
    tile_m = tile_m0
    while tile_m > 16 and need(tile_m, I, True) > budget:
        tile_m = max(16, _round_up(tile_m // 2, 16))
    if need(tile_m, I, True) <= budget or I % 128 != 0:
        return tile_m, I, need(tile_m, I, True)

    # Fallback (very large intermediate dims): tile N too, with N on the
    # OUTER grid axis so each weight slab is still fetched from HBM once.
    tile_m = tile_m0
    while True:
        tile_n = 128
        t = 256
        while t <= I:
            if I % t == 0 and need(tile_m, t, False) <= budget:
                tile_n = t
            t += 128
        if need(tile_m, tile_n, False) <= budget or tile_m <= 16:
            return tile_m, tile_n, need(tile_m, tile_n, False)
        tile_m = max(16, _round_up(tile_m // 2, 16))


@functools.partial(
    jax.jit,
    static_argnames=("tile_m_max", "out_dtype", "use_bf16_matmul",
                     "approximate_gelu"))
def vit_intermediate(hidden_states, weight, bias, *, tile_m_max=512,
                     out_dtype=None, use_bf16_matmul=True,
                     approximate_gelu=False):
    """hidden_states: [B, S, H]; weight: [H, I]; bias: [I] -> [B, S, I]."""
    B, S, H = hidden_states.shape
    I = weight.shape[1]
    M = B * S

    if out_dtype is None:
        out_dtype = hidden_states.dtype      # match the PyTorch module
    mm_dtype = (jnp.bfloat16 if use_bf16_matmul
                else jnp.promote_types(hidden_states.dtype, weight.dtype))

    x_isize = jnp.dtype(hidden_states.dtype).itemsize
    w_isize = jnp.dtype(mm_dtype).itemsize
    out_isize = jnp.dtype(out_dtype).itemsize

    tile_m, tile_n, vmem_need = _derive_tiles(
        M, H, I, x_isize, w_isize, out_isize, tile_m_max)
    m_tiles = pl.cdiv(M, tile_m)
    n_tiles = I // tile_n

    # Activations go straight in: no pad, no slice, no wrapper-side cast
    # (the bf16 cast happens in-kernel).  Weight is pre-cast once.
    x2d = hidden_states.reshape(M, H)
    w = weight.astype(mm_dtype)
    b2d = bias.reshape(1, I).astype(jnp.float32)

    kernel = functools.partial(_intermediate_kernel, mm_dtype=mm_dtype,
                               approximate_gelu=approximate_gelu)

    if n_tiles == 1:
        # Weight + bias VMEM-resident; 1-D grid over M tiles only.
        grid = (m_tiles,)
        in_specs = [
            pl.BlockSpec((tile_m, H), lambda i: (i, 0)),   # activations
            _const_spec((H, I), lambda i: (0, 0)),         # resident weight
            _const_spec((1, I), lambda i: (0, 0)),          # resident bias
        ]
        out_specs = pl.BlockSpec((tile_m, I), lambda i: (i, 0))
        dim_sem = ("parallel",)
        x_streams = 1
    else:
        # N on the outer axis: each weight slab is DMA'd once in total.
        grid = (n_tiles, m_tiles)
        in_specs = [
            pl.BlockSpec((tile_m, H), lambda j, i: (i, 0)),
            pl.BlockSpec((H, tile_n), lambda j, i: (0, j)),
            pl.BlockSpec((1, tile_n), lambda j, i: (0, j)),
        ]
        out_specs = pl.BlockSpec((tile_m, tile_n), lambda j, i: (i, j))
        dim_sem = ("parallel", "parallel")
        x_streams = n_tiles

    # Cost estimate reflects the actual DMA pattern (weight fetched once).
    cost = pl.CostEstimate(
        flops=2 * M * H * I,
        transcendentals=M * I,                      # erf / tanh
        bytes_accessed=(x_streams * M * H * x_isize
                        + H * I * w_isize
                        + I * 4
                        + M * I * out_isize))

    capacity = _vmem_capacity_bytes()
    vmem_limit = int(min(capacity, max(32 << 20, vmem_need + (4 << 20))))

    out2d = pl.pallas_call(
        kernel,
        out_shape=jax.ShapeDtypeStruct((M, I), out_dtype),
        grid_spec=pltpu.PrefetchScalarGridSpec(
            num_scalar_prefetch=0,
            grid=grid,
            in_specs=in_specs,
            out_specs=out_specs,
        ),
        compiler_params=pltpu.CompilerParams(
            dimension_semantics=dim_sem,
            vmem_limit_bytes=vmem_limit),
        cost_estimate=cost,
    )(x2d, w, b2d)

    return out2d.reshape(B, S, I)


def _reference(hidden_states, weight, bias, *, use_bf16_matmul=True):
    # Mirror the kernel's numerics: bf16 matmul operands, f32 accumulation,
    # exact erf GELU, output in the input dtype.
    if use_bf16_matmul:
        x = hidden_states.astype(jnp.bfloat16)
        w = weight.astype(jnp.bfloat16)
    else:
        x, w = hidden_states, weight
    y = jnp.einsum("bsh,hi->bsi", x, w,
                   preferred_element_type=jnp.float32) + bias
    y = 0.5 * y * (1.0 + jax.lax.erf(y * _INV_SQRT2))
    return y.astype(hidden_states.dtype)


if __name__ == "__main__":
    # Small ViT-ish config with the standard 197-token sequence: exercises the
    # ragged/masked tail tile (no wrapper pad) and the >=2 M-tile split.
    B, S, H, I = 2, 197, 128, 512

    key = jax.random.PRNGKey(0)
    k_x, k_w, k_b = jax.random.split(key, 3)

    hidden_states = jax.random.normal(k_x, (B, S, H), dtype=jnp.float32)
    # PyTorch nn.Linear stores weight as [I, H]; we pass its transpose [H, I],
    # which is what the matmul consumes.
    weight = jax.random.normal(k_w, (H, I), dtype=jnp.float32) * (1.0 / math.sqrt(H))
    bias = jax.random.normal(k_b, (I,), dtype=jnp.float32) * 0.02

    out = vit_intermediate(hidden_states, weight, bias)
    out = jax.block_until_ready(out)

    ref = _reference(hidden_states, weight, bias)
    assert out.shape == (B, S, I)
    err = jnp.max(jnp.abs(out.astype(jnp.float32) - ref.astype(jnp.float32)))
    assert jnp.allclose(out, ref, atol=5e-3, rtol=5e-3), (
        f"mismatch vs reference (max abs err {err})")

    print("KERNEL_OK")
</pallas_src>

<mosaic_0001>
module attributes {stable_mosaic.version = 11 : i64} {
  func.func @_intermediate_kernel(%arg0: i32, %arg1: memref<208x128xf32, #tpu.memory_space<vmem>>, %arg2: memref<128x512xbf16, #tpu.memory_space<vmem>>, %arg3: memref<1x512xf32, #tpu.memory_space<vmem>>, %arg4: memref<208x512xf32, #tpu.memory_space<vmem>>) attributes {dimension_semantics = [#tpu.dimension_semantics<parallel>], iteration_bounds = array<i64: 2>, scalar_prefetch = 0 : i64, scratch_operands = 0 : i64, tpu.core_type = #tpu.core_type<tc>, window_params = [{transform_indices = @transform_0, window_bounds = array<i64: 208, 128>}, {pipeline_mode = #tpu.pipeline_mode<synchronous>, transform_indices = @transform_1, window_bounds = array<i64: 128, 512>}, {pipeline_mode = #tpu.pipeline_mode<synchronous>, transform_indices = @transform_2, window_bounds = array<i64: 1, 512>}, {transform_indices = @transform_3, window_bounds = array<i64: 208, 512>}]} {
    %c0 = arith.constant 0 : index
    %c0_0 = arith.constant 0 : index
    %0 = vector.load %arg1[%c0, %c0_0] : memref<208x128xf32, #tpu.memory_space<vmem>>, vector<208x128xf32>
    %1 = arith.truncf %0 : vector<208x128xf32> to vector<208x128xbf16>
    %c0_1 = arith.constant 0 : index
    %c0_2 = arith.constant 0 : index
    %2 = vector.load %arg2[%c0_1, %c0_2] : memref<128x512xbf16, #tpu.memory_space<vmem>>, vector<128x512xbf16>
    %cst = arith.constant dense<0.000000e+00> : vector<208x512xf32>
    %3 = tpu.matmul %1, %2, %cst {dimension_numbers = #tpu.dot_dimension_numbers<[1], [0], [0], [1], [0, 0, 1, 1], [], []>} : vector<208x128xbf16>, vector<128x512xbf16>, vector<208x512xf32> -> vector<208x512xf32>
    %c0_3 = arith.constant 0 : index
    %c0_4 = arith.constant 0 : index
    %4 = vector.load %arg3[%c0_3, %c0_4] : memref<1x512xf32, #tpu.memory_space<vmem>>, vector<1x512xf32>
    %5 = vector.broadcast %4 : vector<1x512xf32> to vector<208x512xf32>
    %6 = arith.addf %3, %5 : vector<208x512xf32>
    %cst_5 = arith.constant 5.000000e-01 : f32
    %7 = vector.broadcast %cst_5 : f32 to vector<208x512xf32>
    %8 = arith.mulf %7, %6 : vector<208x512xf32>
    %cst_6 = arith.constant 0.707106769 : f32
    %9 = vector.broadcast %cst_6 : f32 to vector<208x512xf32>
    %10 = arith.mulf %6, %9 : vector<208x512xf32>
    %11 = math.erf %10 : vector<208x512xf32>
    %cst_7 = arith.constant 1.000000e+00 : f32
    %12 = vector.broadcast %cst_7 : f32 to vector<208x512xf32>
    %13 = arith.addf %12, %11 : vector<208x512xf32>
    %14 = arith.mulf %8, %13 : vector<208x512xf32>
    %c0_8 = arith.constant 0 : index
    %c0_9 = arith.constant 0 : index
    %15 = vector.load %arg4[%c0_8, %c0_9] : memref<208x512xf32, #tpu.memory_space<vmem>>, vector<208x512xf32>
    tpu.vector_store %arg4[%c0_8, %c0_9], %14 {strides = array<i32>} : memref<208x512xf32, #tpu.memory_space<vmem>>, vector<208x512xf32>,
    return
  }
  func.func @transform_0(%arg0: i32) -> (i32, i32) {
    %c0_i32 = arith.constant 0 : i32
    %c0_i32_0 = arith.constant 0 : i32
    return %arg0, %c0_i32 : i32, i32
  }
  func.func @transform_1(%arg0: i32) -> (i32, i32) {
    %c0_i32 = arith.constant 0 : i32
    %c0_i32_0 = arith.constant 0 : i32
    %c0_i32_1 = arith.constant 0 : i32
    return %c0_i32, %c0_i32_0 : i32, i32
  }
  func.func @transform_2(%arg0: i32) -> (i32, i32) {
    %c0_i32 = arith.constant 0 : i32
    %c0_i32_0 = arith.constant 0 : i32
    %c0_i32_1 = arith.constant 0 : i32
    return %c0_i32, %c0_i32_0 : i32, i32
  }
  func.func @transform_3(%arg0: i32) -> (i32, i32) {
    %c0_i32 = arith.constant 0 : i32
    %c0_i32_0 = arith.constant 0 : i32
    return %arg0, %c0_i32 : i32, i32
  }
}

</mosaic_0001>

<bundles_post_ra>
// kernel: vit_intermediate.1
= control target key start
LH: loop header
LB: loop body
LE: loop exit
PB: predicated region body
PF: predicated region fallthrough
CT: control target
= control target key end

     0   :  { %s2200_s12 = smov 0   ;;  %s2202_s13 = smov 0   ;;  %s3451_s0 = inlined_call_operand.vmem [shape: f32[394,128], index: 0, kind: input, shape index: {}]   ;;  %s3452_s1 = inlined_call_operand.vmem [shape: bf16[128,512], index: 1, kind: input, shape index: {}]   ;;  %s3453_s2 = inlined_call_operand.vmem [shape: f32[1,512], index: 2, kind: input, shape index: {}]   ;;  %s3454_s3 = inlined_call_operand.vmem [shape: f32[394,512], index: 3, kind: output, shape index: {}]  }
   0x1   :  { %s2204_s14 = smov 0  }
   0x2 LB: > { %s2213_s15 = sadd.s32 4294967295, %s2145_s14   ;;  %s2215_s16 = sadd.s32 1, %s2145_s14   ;;  %s2145_s14 = sphi %s2204_s14, %s3467_s14   ;;  %s2141_s13 = sphi %s2202_s13, %s3466_s13   ;;  %s2137_s12 = sphi %s2200_s12, %s3465_s12  }
   0x3   : > { %s85_s17 = ssub.s32 %s2145_s14, %s2215_s16  ;;  %s88_s18 = sadd.s32 1, %s2141_s13 }
   0x4   : > { %p86_p0 = scmp.eq.s32.totalorder %s85_s17, 0  ;;  %p98_p1 = scmp.ne.s32.totalorder %s2141_s13, %s2137_s12 }
   0x5   : > { %p99_p2 = scmp.eq.s32.totalorder %s2213_s15, 1  ;;  %p1688_p3 = scmp.ge.s32.totalorder %s2145_s14, 1 }
   0x6   : > { %s2223_s19 = scalar_select %p86_p0, %s2141_s13, %s88_s18  }
   0x7   : > { %p2225_p4 = por %p99_p2, %p98_p1  ;;  %p146_p5 = scmp.lt.s32.totalorder %s2145_s14, 3 }
   0x9   : > { %p147_p6 = pnand %p1688_p3, %p146_p5 }
   0xb   : > { %150 = sbr.rel (%p147_p6) target bundleno = 505 (0x1f9), region = 32 }
  0x12   : > { %v1835_v0 = vld [vmem:[%s3452_s1 + $0x4] ss:$16 sps:$4 sm:$0xff]   ;;  %v1837_v1 = vld [vmem:[%s3452_s1 + $0xc] ss:$16 sps:$4 sm:$0xff]   ;;  %v2179_v2 = vmov 0   ;;  %s2274_s28 = smul.u32 26, %s2213_s15 }
  0x13   : > { %479 = vmatprep.mubr.bf16.mxu0 %v2179_v2  ;;  %642 = vmatprep.mubr.bf16.mxu1 %v2179_v2  ;;  %v1839_v3 = vld [vmem:[%s3452_s1] ss:$16 sps:$4 sm:$0xff]   ;;  %v1840_v4 = vld [vmem:[%s3452_s1 + $0x8] ss:$16 sps:$4 sm:$0xff]   ;;  %v1841_v5 = vld [vmem:[%s3452_s1 + $0x24] ss:$16 sps:$4 sm:$0xff]  }
  0x14   : > { %447 = vmatprep.subr.bf16.mxu0 %v1835_v0  ;;  %610 = vmatprep.subr.bf16.mxu1 %v1837_v1  ;;  %v1843_v6 = vld [vmem:[%s3452_s1 + $0x2c] ss:$16 sps:$4 sm:$0xff]   ;;  %v1845_v7 = vld [vmem:[%s3452_s1 + $0x20] ss:$16 sps:$4 sm:$0xff]   ;;  %v1846_v8 = vld [vmem:[%s3452_s1 + $0x28] ss:$16 sps:$4 sm:$0xff]  }
  0x15   : > { %448 = vmatpush1.bf16.msra.mxu0 %v1839_v3  ;;  %611 = vmatpush1.bf16.msra.mxu1 %v1840_v4  ;;  %v1847_v9 = vld [vmem:[%s3452_s1 + $0x44] ss:$16 sps:$4 sm:$0xff]   ;;  %v1849_v10 = vld [vmem:[%s3452_s1 + $0x4c] ss:$16 sps:$4 sm:$0xff]   ;;  %v1851_v11 = vld [vmem:[%s3452_s1 + $0x40] ss:$16 sps:$4 sm:$0xff]  }
  0x16   : > { %449 = vmatprep.subr.bf16.mxu0 %v1841_v5  ;;  %612 = vmatprep.subr.bf16.mxu1 %v1843_v6  ;;  %v1852_v12 = vld [vmem:[%s3452_s1 + $0x48] ss:$16 sps:$4 sm:$0xff]   ;;  %v1853_v13 = vld [vmem:[%s3452_s1 + $0x64] ss:$16 sps:$4 sm:$0xff]   ;;  %v1855_v14 = vld [vmem:[%s3452_s1 + $0x6c] ss:$16 sps:$4 sm:$0xff]  }
  0x17   : > { %v1857_v15 = vld [vmem:[%s3452_s1 + $0x60] ss:$16 sps:$4 sm:$0xff]   ;;  %v1858_v16 = vld [vmem:[%s3452_s1 + $0x68] ss:$16 sps:$4 sm:$0xff]   ;;  %v1859_v17 = vld [vmem:[%s3452_s1 + $0x84] ss:$16 sps:$4 sm:$0xff]  }
  0x18   : > { %v1861_v18 = vld [vmem:[%s3452_s1 + $0x8c] ss:$16 sps:$4 sm:$0xff]   ;;  %p178_p7 = scmp.lt.s32.totalorder %s2274_s28, 49  ;;  %v1863_v19 = vld [vmem:[%s3452_s1 + $0x80] ss:$16 sps:$4 sm:$0xff]   ;;  %s170_s5 = sand.u32 1, %s2137_s12  }
  0x19   : > { %450 = vmatpush1.bf16.msra.mxu0 %v1845_v7  ;;  %613 = vmatpush1.bf16.msra.mxu1 %v1846_v8  ;;  %v1864_v20 = vld [vmem:[%s3452_s1 + $0x88] ss:$16 sps:$4 sm:$0xff]   ;;  %v1865_v21 = vld [vmem:[%s3452_s1 + $0xa4] ss:$16 sps:$4 sm:$0xff]   ;;  %v1867_v22 = vld [vmem:[%s3452_s1 + $0xac] ss:$16 sps:$4 sm:$0xff]  }
  0x1a   : > { %451 = vmatprep.subr.bf16.mxu0 %v1847_v9  ;;  %614 = vmatprep.subr.bf16.mxu1 %v1849_v10  ;;  %s179_s24 = scalar_select %p178_p7, %s2274_s28, 49  ;;  %v1869_v23 = vld [vmem:[%s3452_s1 + $0xa0] ss:$16 sps:$4 sm:$0xff]   ;;  %v1870_v24 = vld [vmem:[%s3452_s1 + $0xa8] ss:$16 sps:$4 sm:$0xff]   ;;  %v267_v9 = vlaneseq }
  0x1b   : > { %v1871_v25 = vld [vmem:[%s3452_s1 + $0xc4] ss:$16 sps:$4 sm:$0xff]   ;;  %v1873_v26 = vld [vmem:[%s3452_s1 + $0xcc] ss:$16 sps:$4 sm:$0xff]   ;;  %v1875_v27 = vld [vmem:[%s3452_s1 + $0xc0] ss:$16 sps:$4 sm:$0xff]  }
  0x1c   : > { %s1689_s7 = sshll.u32 %s179_s24, 3  ;;  %v1876_v28 = vld [vmem:[%s3452_s1 + $0xc8] ss:$16 sps:$4 sm:$0xff]   ;;  %v1877_v29 = vld [vmem:[%s3452_s1 + $0xe4] ss:$16 sps:$4 sm:$0xff]   ;;  %v268_v10 = vshrl.u32 %v267_v9, 7 }
  0x1d   : > { %452 = vmatpush1.bf16.msra.mxu0 %v1851_v11  ;;  %615 = vmatpush1.bf16.msra.mxu1 %v1852_v12  ;;  %v1879_v30 = vld [vmem:[%s3452_s1 + $0xec] ss:$16 sps:$4 sm:$0xff]   ;;  %s2329_s24 = scalar_lea.vmem %s3451_s0, %s1689_s7  ;;  %v1881_v31 = vld [vmem:[%s3452_s1 + $0xe0] ss:$16 sps:$4 sm:$0xff]   ;;  %v1882_v32 = vld [vmem:[%s3452_s1 + $0xe8] ss:$16 sps:$4 sm:$0xff]  }
  0x1e   : > { %453 = vmatprep.subr.bf16.mxu0 %v1853_v13  ;;  %616 = vmatprep.subr.bf16.mxu1 %v1855_v14  ;;  %v194_v33 = vld [vmem:[%s2329_s24] sm:$0xff]  ;;  %v195_v34 = vld [vmem:[%s2329_s24 + $0x8] sm:$0xff]  ;;  %v196_v36 = vld [vmem:[%s2329_s24 + $0x10] sm:$0xff]  ;;  %v269_v11 = vsub.s32 0, %v268_v10  ;;  %v277_v12 = vsub.s32 2, %v268_v10  ;;  %v273_v14 = vsub.s32 1, %v268_v10 }
  0x1f   : > { %v220_v35 = vpack.c.bf16 %v195_v34, %v194_v33  ;;  %v197_v37 = vld [vmem:[%s2329_s24 + $0x18] sm:$0xff]  ;;  %v198_v39 = vld [vmem:[%s2329_s24 + $0x20] sm:$0xff]  ;;  %v199_v40 = vld [vmem:[%s2329_s24 + $0x28] sm:$0xff]  ;;  %s2417_s12 = smul.u32 832, %s170_s5  ;;  %s1405_s7 = ssub.s32 (%p2225_p4), 50, %s2274_s28 }
  0x20   : > { %v221_v38 = vpack.c.bf16 %v197_v37, %v196_v36  ;;  %v222_v41 = vpack.c.bf16 %v199_v40, %v198_v39  ;;  %v200_v42 = vld [vmem:[%s2329_s24 + $0x30] sm:$0xff]  ;;  %v201_v43 = vld [vmem:[%s2329_s24 + $0x38] sm:$0xff]  ;;  %v202_v45 = vld [vmem:[%s2329_s24 + $0x40] sm:$0xff]  ;;  %s1744_s8 = smul.u32 (%p2225_p4), 832, %s2213_s15  ;;  %p1406_p8 = scmp.lt.s32.totalorder (%p2225_p4), %s1405_s7, 26 }
  0x21   : > { %454 = vmatpush1.bf16.msra.mxu0 %v1857_v15  ;;  %617 = vmatpush1.bf16.msra.mxu1 %v1858_v16  ;;  %v223_v44 = vpack.c.bf16 %v201_v43, %v200_v42  ;;  %v203_v46 = vld [vmem:[%s2329_s24 + $0x48] sm:$0xff]  ;;  %v204_v48 = vld [vmem:[%s2329_s24 + $0x50] sm:$0xff]  ;;  %v205_v49 = vld [vmem:[%s2329_s24 + $0x58] sm:$0xff]  ;;  %v281_v15 = vsub.s32 3, %v268_v10  ;;  %s2442_s6 = scalar_lea.vmem [#allocation2], %s2417_s12  }
  0x22   : > { %455 = vmatprep.subr.bf16.mxu0 %v1859_v17  ;;  %618 = vmatprep.subr.bf16.mxu1 %v1861_v18  ;;  %v224_v47 = vpack.c.bf16 %v203_v46, %v202_v45  ;;  %v225_v50 = vpack.c.bf16 %v205_v49, %v204_v48  ;;  %v206_v51 = vld [vmem:[%s2329_s24 + $0x60] sm:$0xff]  ;;  %v207_v52 = vld [vmem:[%s2329_s24 + $0x68] sm:$0xff]  ;;  %v208_v54 = vld [vmem:[%s2329_s24 + $0x70] sm:$0xff]  ;;  %s3234_s11 = scalar_lea.vmem (%p2225_p4), %s3454_s3, %s1744_s8  }
  0x23   : > { %v226_v53 = vpack.c.bf16 %v207_v52, %v206_v51  ;;  %v209_v55 = vld [vmem:[%s2329_s24 + $0x78] sm:$0xff]  ;;  %v210_v57 = vld [vmem:[%s2329_s24 + $0x80] sm:$0xff]  ;;  %v211_v58 = vld [vmem:[%s2329_s24 + $0x88] sm:$0xff] }
  0x24   : > { %v227_v56 = vpack.c.bf16 %v209_v55, %v208_v54  ;;  %v228_v59 = vpack.c.bf16 %v211_v58, %v210_v57  ;;  %v212_v60 = vld [vmem:[%s2329_s24 + $0x90] sm:$0xff]  ;;  %v213_v61 = vld [vmem:[%s2329_s24 + $0x98] sm:$0xff]  ;;  %v214_v63 = vld [vmem:[%s2329_s24 + $0xa0] sm:$0xff] }
  0x25   : > { %456 = vmatpush1.bf16.msra.mxu0 %v1863_v19  ;;  %619 = vmatpush1.bf16.msra.mxu1 %v1864_v20  ;;  %v229_v62 = vpack.c.bf16 %v213_v61, %v212_v60  ;;  %v215_v0 = vld [vmem:[%s2329_s24 + $0xa8] sm:$0xff]  ;;  %v216_v3 = vld [vmem:[%s2329_s24 + $0xb0] sm:$0xff]  ;;  %v217_v4 = vld [vmem:[%s2329_s24 + $0xb8] sm:$0xff] }
  0x26   : > { %457 = vmatprep.subr.bf16.mxu0 %v1865_v21  ;;  %620 = vmatprep.subr.bf16.mxu1 %v1867_v22  ;;  %v230_v1 = vpack.c.bf16 %v215_v0, %v214_v63  ;;  %v231_v5 = vpack.c.bf16 %v217_v4, %v216_v3  ;;  %v218_v6 = vld [vmem:[%s2329_s24 + $0xc0] sm:$0xff]  ;;  %v219_v7 = vld [vmem:[%s2329_s24 + $0xc8] sm:$0xff] }
  0x27   : > { %v232_v8 = vpack.c.bf16 %v219_v7, %v218_v6  ;;  %v265_v13 = vld [vmem:[%s3453_s2] sm:$0xf] }
  0x28   : > { %v2390_v16 = vrot.slane %v265_v13, %v269_v11  ;;  %v2392_v17 = vrot.slane %v265_v13, %v277_v12  ;;  %v2396_v18 = vrot.slane %v265_v13, %v281_v15 }
  0x29   : > { %458 = vmatpush1.bf16.msra.mxu0 %v1869_v23  ;;  %621 = vmatpush1.bf16.msra.mxu1 %v1870_v24 }
  0x2a   : > { %459 = vmatprep.subr.bf16.mxu0 %v1871_v25  ;;  %622 = vmatprep.subr.bf16.mxu1 %v1873_v26 }
  0x2d   : > { %460 = vmatpush1.bf16.msra.mxu0 %v1875_v27  ;;  %623 = vmatpush1.bf16.msra.mxu1 %v1876_v28 }
  0x2e   : > { %461 = vmatprep.subr.bf16.mxu0 %v1877_v29  ;;  %624 = vmatprep.subr.bf16.mxu1 %v1879_v30 }
  0x31   : > { %462 = vmatpush1.bf16.msra.mxu0 %v1881_v31  ;;  %625 = vmatpush1.bf16.msra.mxu1 %v1882_v32 }
  0x34   : > { %480 = vmatmul.mubr.bf16.vlgmr.msra.gmra.mrb[0].mxu0 %v220_v35  ;;  %643 = vmatmul.mubr.bf16.vlgmr.msra.gmra.mrb[0].mxu1 %v220_v35 }
  0x35   : > { %489 = vmatprep.mubr.bf16.mxu0 %v2179_v2  ;;  %652 = vmatprep.mubr.bf16.mxu1 %v2179_v2 }
  0x3c   : > { %490 = vmatmul.mubr.bf16.gmra.mrb[4].mxu0 %v221_v38  ;;  %653 = vmatmul.mubr.bf16.gmra.mrb[4].mxu1 %v221_v38 }
  0x3d   : > { %499 = vmatprep.mubr.bf16.mxu0 %v2179_v2  ;;  %662 = vmatprep.mubr.bf16.mxu1 %v2179_v2 }
  0x44   : > { %500 = vmatmul.mubr.bf16.gmra.mrb[8].mxu0 %v222_v41  ;;  %663 = vmatmul.mubr.bf16.gmra.mrb[8].mxu1 %v222_v41 }
  0x45   : > { %509 = vmatprep.mubr.bf16.mxu0 %v2179_v2  ;;  %672 = vmatprep.mubr.bf16.mxu1 %v2179_v2 }
  0x4c   : > { %510 = vmatmul.mubr.bf16.gmra.mrb[12].mxu0 %v223_v44  ;;  %673 = vmatmul.mubr.bf16.gmra.mrb[12].mxu1 %v223_v44 }
  0x4d   : > { %519 = vmatprep.mubr.bf16.mxu0 %v2179_v2  ;;  %682 = vmatprep.mubr.bf16.mxu1 %v2179_v2 }
  0x54   : > { %520 = vmatmul.mubr.bf16.gmra.mrb[16].mxu0 %v224_v47  ;;  %683 = vmatmul.mubr.bf16.gmra.mrb[16].mxu1 %v224_v47 }
  0x55   : > { %529 = vmatprep.mubr.bf16.mxu0 %v2179_v2  ;;  %692 = vmatprep.mubr.bf16.mxu1 %v2179_v2 }
  0x5c   : > { %530 = vmatmul.mubr.bf16.gmra.mrb[20].mxu0 %v225_v50  ;;  %693 = vmatmul.mubr.bf16.gmra.mrb[20].mxu1 %v225_v50 }
  0x5d   : > { %539 = vmatprep.mubr.bf16.mxu0 %v2179_v2  ;;  %702 = vmatprep.mubr.bf16.mxu1 %v2179_v2 }
  0x64   : > { %540 = vmatmul.mubr.bf16.gmra.mrb[24].mxu0 %v226_v53  ;;  %703 = vmatmul.mubr.bf16.gmra.mrb[24].mxu1 %v226_v53 }
  0x65   : > { %549 = vmatprep.mubr.bf16.mxu0 %v2179_v2  ;;  %712 = vmatprep.mubr.bf16.mxu1 %v2179_v2 }
  0x6c   : > { %550 = vmatmul.mubr.bf16.gmra.mrb[28].mxu0 %v227_v56  ;;  %713 = vmatmul.mubr.bf16.gmra.mrb[28].mxu1 %v227_v56 }
  0x6d   : > { %559 = vmatprep.mubr.bf16.mxu0 %v2179_v2  ;;  %722 = vmatprep.mubr.bf16.mxu1 %v2179_v2 }
  0x74   : > { %560 = vmatmul.mubr.bf16.gmra.mrb[32].mxu0 %v228_v59  ;;  %723 = vmatmul.mubr.bf16.gmra.mrb[32].mxu1 %v228_v59 }
  0x75   : > { %569 = vmatprep.mubr.bf16.mxu0 %v2179_v2  ;;  %732 = vmatprep.mubr.bf16.mxu1 %v2179_v2 }
  0x7c   : > { %570 = vmatmul.mubr.bf16.gmra.mrb[36].mxu0 %v229_v62  ;;  %733 = vmatmul.mubr.bf16.gmra.mrb[36].mxu1 %v229_v62 }
  0x7d   : > { %579 = vmatprep.mubr.bf16.mxu0 %v2179_v2  ;;  %742 = vmatprep.mubr.bf16.mxu1 %v2179_v2 }
  0x84   : > { %580 = vmatmul.mubr.bf16.gmra.mrb[40].mxu0 %v230_v1  ;;  %743 = vmatmul.mubr.bf16.gmra.mrb[40].mxu1 %v230_v1 }
  0x85   : > { %589 = vmatprep.mubr.bf16.mxu0 %v2179_v2  ;;  %752 = vmatprep.mubr.bf16.mxu1 %v2179_v2 }
  0x8c   : > { %590 = vmatmul.mubr.bf16.gmra.mrb[44].mxu0 %v231_v5  ;;  %753 = vmatmul.mubr.bf16.gmra.mrb[44].mxu1 %v231_v5 }
  0x8d   : > { %599 = vmatprep.mubr.bf16.mxu0 %v2179_v2  ;;  %762 = vmatprep.mubr.bf16.mxu1 %v2179_v2  ;;  %v2394_v2 = vrot.slane %v265_v13, %v273_v14 }
  0x94   : > { %600 = vmatmul.mubr.bf16.gmra.mrb[48].mxu0 %v232_v8  ;;  %763 = vmatmul.mubr.bf16.gmra.mrb[48].mxu1 %v232_v8 }
 0x107   : > { %v481_v19 = vpop.f32.mrb[0].mxu0  ;;  %v644_v20 = vpop.f32.mrb[0].mxu1 }
 0x108   : > { %v482_v21 = vadd.f32 %v481_v19, %v2390_v16  ;;  %v645_v22 = vadd.f32 %v644_v20, %v2392_v17  ;;  %v483_v23 = vpop.f32.mrb[1].mxu0  ;;  %v646_v24 = vpop.f32.mrb[1].mxu1 }
 0x109   : > { %v484_v25 = vadd.f32 %v483_v23, %v2394_v2  ;;  %v647_v26 = vadd.f32 %v646_v24, %v2396_v18  ;;  %v485_v27 = vpop.f32.mrb[2].mxu0  ;;  %v648_v28 = vpop.f32.mrb[2].mxu1 }
 0x10a   : > { %v877_v29 = vmul.f32 0.70710677, %v482_v21  ;;  %v879_v30 = vmul.f32 0.70710677, %v645_v22  ;;  %v486_v33 = vadd.f32 %v485_v27, %v2390_v16  ;;  %v649_v34 = vadd.f32 %v648_v28, %v2392_v17  ;;  %v487_v35 = vpop.f32.mrb[3].mxu0  ;;  %v650_v36 = vpop.f32.mrb[3].mxu1 }
 0x10b   : > { %v878_v31 = vmul.f32 0.70710677, %v484_v25  ;;  %v880_v32 = vmul.f32 0.70710677, %v647_v26  ;;  %v488_v37 = vadd.f32 %v487_v35, %v2394_v2  ;;  %v651_v38 = vadd.f32 %v650_v36, %v2396_v18 }
 0x10c   : > { %1883 = verf.f32 %v877_v29  ;;  %v881_v39 = vmul.f32 0.70710677, %v486_v33  ;;  %v883_v40 = vmul.f32 0.70710677, %v649_v34  ;;  %v773_v55 = vmul.f32 0.5, %v482_v21 }
 0x10d   : > { %1885 = verf.f32 %v879_v30  ;;  %v882_v41 = vmul.f32 0.70710677, %v488_v37  ;;  %v884_v43 = vmul.f32 0.70710677, %v651_v38  ;;  %v775_v56 = vmul.f32 0.5, %v645_v22 }
 0x10e   : > { %1887 = verf.f32 %v878_v31  ;;  %v774_v59 = vmul.f32 0.5, %v484_v25  ;;  %v776_v3 = vmul.f32 0.5, %v647_v26  ;;  %v777_v4 = vmul.f32 0.5, %v486_v33 }
 0x10f   : > { %1889 = verf.f32 %v880_v32  ;;  %v491_v42 = vpop.f32.mrb[4].mxu0  ;;  %v654_v45 = vpop.f32.mrb[4].mxu1  ;;  %v779_v5 = vmul.f32 0.5, %v649_v34  ;;  %v778_v14 = vmul.f32 0.5, %v488_v37  ;;  %v780_v15 = vmul.f32 0.5, %v651_v38 }
 0x110   : > { %1891 = verf.f32 %v881_v39  ;;  %v492_v44 = vadd.f32 %v491_v42, %v2390_v16  ;;  %v493_v46 = vpop.f32.mrb[5].mxu0  ;;  %v2409_v47 = vadd.f32 %v654_v45, %v2392_v17  ;;  %v656_v49 = vpop.f32.mrb[5].mxu1 }
 0x111   : > { %1893 = verf.f32 %v883_v40  ;;  %v2412_v48 = vadd.f32 %v493_v46, %v2394_v2  ;;  %v495_v50 = vpop.f32.mrb[6].mxu0  ;;  %v2415_v52 = vadd.f32 %v656_v49, %v2396_v18  ;;  %v658_v53 = vpop.f32.mrb[6].mxu1 }
 0x112   : > { %1895 = verf.f32 %v882_v41  ;;  %v885_v51 = vmul.f32 0.70710677, %v492_v44  ;;  %v497_v54 = vpop.f32.mrb[7].mxu0  ;;  %v887_v57 = vmul.f32 0.70710677, %v2409_v47  ;;  %v660_v58 = vpop.f32.mrb[7].mxu1  ;;  %v2423_v62 = vadd.f32 %v495_v50, %v2390_v16 }
 0x113   : > { %1897 = verf.f32 %v884_v43  ;;  %v886_v60 = vmul.f32 0.70710677, %v2412_v48  ;;  %v888_v61 = vmul.f32 0.70710677, %v2415_v52  ;;  %v2426_v63 = vadd.f32 %v658_v53, %v2392_v17 }
 0x114   : > { %1899 = verf.f32 %v885_v51  ;;  %v2429_v0 = vadd.f32 %v497_v54, %v2394_v2  ;;  %v889_v8 = vmul.f32 0.70710677, %v2423_v62  ;;  %v2433_v9 = vadd.f32 %v660_v58, %v2396_v18 }
 0x115   : > { %1901 = verf.f32 %v887_v57  ;;  %v891_v19 = vmul.f32 0.70710677, %v2426_v63  ;;  %v781_v30 = vmul.f32 0.5, %v492_v44  ;;  %v783_v53 = vmul.f32 0.5, %v2409_v47 }
 0x116   : > { %v1884_v1 = vpop.eup %1883  ;;  %1903 = verf.f32 %v886_v60  ;;  %v890_v24 = vmul.f32 0.70710677, %v2429_v0  ;;  %v892_v36 = vmul.f32 0.70710677, %v2433_v9  ;;  %v782_v58 = vmul.f32 0.5, %v2412_v48 }
 0x117   : > { %v1886_v6 = vpop.eup %1885  ;;  %v1085_v7 = vadd.f32 1.0, %v1884_v1  ;;  %1905 = verf.f32 %v888_v61  ;;  %v501_v10 = vpop.f32.mrb[8].mxu0 }
 0x118   : > { %v664_v11 = vpop.f32.mrb[8].mxu1  ;;  %v1888_v12 = vpop.eup %1887  ;;  %v1087_v13 = vadd.f32 1.0, %v1886_v6  ;;  %1907 = verf.f32 %v889_v8  ;;  %v2450_v41 = vadd.f32 %v501_v10, %v2390_v16 }
 0x119   : > { %v503_v20 = vpop.f32.mrb[9].mxu0  ;;  %v1890_v21 = vpop.eup %1889  ;;  %v1189_v22 = vmul.f32 %v1085_v7, %v773_v55  ;;  %v1086_v23 = vadd.f32 1.0, %v1888_v12  ;;  %1909 = verf.f32 %v891_v19  ;;  %v2453_v42 = vadd.f32 %v664_v11, %v2392_v17 }
 0x11a   : > { %v666_v25 = vpop.f32.mrb[9].mxu1  ;;  %v505_v26 = vpop.f32.mrb[10].mxu0  ;;  %v1191_v28 = vmul.f32 %v1087_v13, %v775_v56  ;;  %v1088_v29 = vadd.f32 1.0, %v1890_v21  ;;  %1911 = verf.f32 %v890_v24  ;;  %v2457_v46 = vadd.f32 %v503_v20, %v2394_v2 }
 0x11b   : > { %v1892_v27 = vpop.eup %1891  ;;  %v2437_v31 = vpop.f32.mrb[10].mxu1  ;;  %1293 = vst [vmem:[%s2442_s6] sm:$0xff] %v1189_v22  ;;  %v1190_v34 = vmul.f32 %v1086_v23, %v774_v59  ;;  %1913 = verf.f32 %v892_v36  ;;  %v893_v54 = vmul.f32 0.70710677, %v2450_v41  ;;  %v895_v59 = vmul.f32 0.70710677, %v2453_v42 }
 0x11c   : > { %v2439_v32 = vpop.f32.mrb[11].mxu0  ;;  %v1894_v33 = vpop.eup %1893  ;;  %v1089_v35 = vadd.f32 1.0, %v1892_v27  ;;  %1295 = vst [vmem:[%s2442_s6 + $0x10] sm:$0xff] %v1191_v28  ;;  %v1192_v39 = vmul.f32 %v1088_v29, %v776_v3  ;;  %v894_v10 = vmul.f32 0.70710677, %v2457_v46  ;;  %v2493_v23 = vadd.f32 %v2437_v31, %v2392_v17 }
 0x11d   : > { %v2446_v37 = vpop.f32.mrb[11].mxu1  ;;  %v1896_v38 = vpop.eup %1895  ;;  %v1091_v40 = vadd.f32 1.0, %v1894_v33  ;;  %1294 = vst [vmem:[%s2442_s6 + $0x8] sm:$0xff] %v1190_v34  ;;  %1915 = verf.f32 %v893_v54  ;;  %v2497_v24 = vadd.f32 %v2439_v32, %v2394_v2  ;;  %v785_v27 = vmul.f32 0.5, %v2423_v62 }
 0x11e   : > { %v1898_v43 = vpop.eup %1897  ;;  %v1193_v44 = vmul.f32 %v1089_v35, %v777_v4  ;;  %v1090_v45 = vadd.f32 1.0, %v1896_v38  ;;  %1296 = vst [vmem:[%s2442_s6 + $0x18] sm:$0xff] %v1192_v39  ;;  %v784_v4 = vmul.f32 0.5, %v2415_v52  ;;  %1917 = verf.f32 %v895_v59 }
 0x11f   : > { %v1900_v49 = vpop.eup %1899  ;;  %v1195_v50 = vmul.f32 %v1091_v40, %v779_v5  ;;  %v1092_v51 = vadd.f32 1.0, %v1898_v43  ;;  %v2465_v60 = vpop.f32.mrb[12].mxu0  ;;  %1919 = verf.f32 %v894_v10  ;;  %v787_v33 = vmul.f32 0.5, %v2426_v63 }
 0x120   : > { %v1902_v55 = vpop.eup %1901  ;;  %1297 = vst [vmem:[%s2442_s6 + $0x20] sm:$0xff] %v1193_v44  ;;  %v1194_v56 = vmul.f32 %v1090_v45, %v778_v14  ;;  %v1093_v57 = vadd.f32 1.0, %v1900_v49  ;;  %v2467_v61 = vpop.f32.mrb[12].mxu1  ;;  %v2481_v14 = vadd.f32 %v666_v25, %v2396_v18  ;;  %v786_v31 = vmul.f32 0.5, %v2429_v0 }
 0x121   : > { %v1904_v1 = vpop.eup %1903  ;;  %1299 = vst [vmem:[%s2442_s6 + $0x30] sm:$0xff] %v1195_v50  ;;  %v1196_v3 = vmul.f32 %v1092_v51, %v780_v15  ;;  %v1095_v47 = vadd.f32 1.0, %v1902_v55  ;;  %v513_v5 = vpop.f32.mrb[13].mxu0  ;;  %v2484_v15 = vadd.f32 %v505_v26, %v2390_v16  ;;  %v899_v62 = vmul.f32 0.70710677, %v2493_v23 }
 0x122   : > { %v2471_v6 = vpop.f32.mrb[13].mxu1  ;;  %v1906_v7 = vpop.eup %1905  ;;  %1298 = vst [vmem:[%s2442_s6 + $0x28] sm:$0xff] %v1194_v56  ;;  %v1197_v48 = vmul.f32 %v1093_v57, %v781_v30  ;;  %v1094_v8 = vadd.f32 1.0, %v1904_v1  ;;  %v896_v29 = vmul.f32 0.70710677, %v2481_v14  ;;  %v788_v40 = vmul.f32 0.5, %v2433_v9 }
 0x123   : > { %v2475_v11 = vpop.f32.mrb[14].mxu0  ;;  %v2477_v12 = vpop.f32.mrb[14].mxu1  ;;  %1300 = vst [vmem:[%s2442_s6 + $0x38] sm:$0xff] %v1196_v3  ;;  %v1199_v13 = vmul.f32 %v1095_v47, %v783_v53  ;;  %v1096_v52 = vadd.f32 1.0, %v1906_v7  ;;  %v897_v35 = vmul.f32 0.70710677, %v2484_v15  ;;  %v2515_v49 = vadd.f32 %v2446_v37, %v2396_v18 }
 0x124   : > { %v2486_v19 = vpop.f32.mrb[15].mxu0  ;;  %v2488_v20 = vpop.f32.mrb[15].mxu1  ;;  %1301 = vst [vmem:[%s2442_s6 + $0x40] sm:$0xff] %v1197_v48  ;;  %v1198_v22 = vmul.f32 %v1094_v8, %v782_v58  ;;  %1921 = verf.f32 %v896_v29  ;;  %v898_v63 = vmul.f32 0.70710677, %v2497_v24  ;;  %v2524_v9 = vadd.f32 %v2465_v60, %v2390_v16 }
 0x125   : > { %v1908_v21 = vpop.eup %1907  ;;  %1303 = vst [vmem:[%s2442_s6 + $0x50] sm:$0xff] %v1199_v13  ;;  %v1200_v26 = vmul.f32 %v1096_v52, %v784_v4  ;;  %1923 = verf.f32 %v897_v35  ;;  %v2528_v53 = vadd.f32 %v2467_v61, %v2392_v17  ;;  %v2531_v54 = vadd.f32 %v513_v5, %v2394_v2 }
 0x126   : > { %v1910_v25 = vpop.eup %1909  ;;  %v1097_v28 = vadd.f32 1.0, %v1908_v21  ;;  %1302 = vst [vmem:[%s2442_s6 + $0x48] sm:$0xff] %v1198_v22  ;;  %1925 = verf.f32 %v899_v62  ;;  %v900_v58 = vmul.f32 0.70710677, %v2515_v49  ;;  %v2541_v59 = vadd.f32 %v2471_v6, %v2396_v18 }
 0x127   : > { %v1912_v30 = vpop.eup %1911  ;;  %v1099_v34 = vadd.f32 1.0, %v1910_v25  ;;  %1304 = vst [vmem:[%s2442_s6 + $0x58] sm:$0xff] %v1200_v26  ;;  %v521_v43 = vpop.f32.mrb[16].mxu0  ;;  %1927 = verf.f32 %v898_v63  ;;  %v789_v3 = vmul.f32 0.5, %v2450_v41  ;;  %v791_v4 = vmul.f32 0.5, %v2453_v42 }
 0x128   : > { %v1201_v32 = vmul.f32 %v1097_v28, %v785_v27  ;;  %v1098_v36 = vadd.f32 1.0, %v1912_v30  ;;  %v1914_v38 = vpop.eup %1913  ;;  %v2510_v44 = vpop.f32.mrb[16].mxu1  ;;  %v901_v5 = vmul.f32 0.70710677, %v2524_v9  ;;  %v790_v48 = vmul.f32 0.5, %v2457_v46 }
 0x129   : > { %v1203_v39 = vmul.f32 %v1099_v34, %v787_v33  ;;  %v1100_v45 = vadd.f32 1.0, %v1914_v38  ;;  %v2517_v50 = vpop.f32.mrb[17].mxu0  ;;  %v2519_v51 = vpop.f32.mrb[17].mxu1  ;;  %1929 = verf.f32 %v900_v58  ;;  %v903_v6 = vmul.f32 0.70710677, %v2528_v53 }
 0x12a   : > { %1305 = vst [vmem:[%s2442_s6 + $0x60] sm:$0xff] %v1201_v32  ;;  %v1202_v0 = vmul.f32 %v1098_v36, %v786_v31  ;;  %v2533_v37 = vpop.f32.mrb[18].mxu0  ;;  %v2535_v55 = vpop.f32.mrb[18].mxu1  ;;  %v792_v13 = vmul.f32 0.5, %v2481_v14  ;;  %1931 = verf.f32 %v901_v5  ;;  %v902_v41 = vmul.f32 0.70710677, %v2531_v54 }
 0x12b   : > { %1307 = vst [vmem:[%s2442_s6 + $0x70] sm:$0xff] %v1203_v39  ;;  %v1916_v56 = vpop.eup %1915  ;;  %v1204_v57 = vmul.f32 %v1100_v45, %v788_v40  ;;  %v2543_v60 = vpop.f32.mrb[19].mxu0  ;;  %1933 = verf.f32 %v903_v6  ;;  %v904_v21 = vmul.f32 0.70710677, %v2541_v59  ;;  %v2559_v46 = vadd.f32 %v2475_v11, %v2390_v16 }
 0x12c   : > { %1306 = vst [vmem:[%s2442_s6 + $0x68] sm:$0xff] %v1202_v0  ;;  %v2545_v61 = vpop.f32.mrb[19].mxu1  ;;  %v1918_v1 = vpop.eup %1917  ;;  %v1101_v47 = vadd.f32 1.0, %v1916_v56  ;;  %1935 = verf.f32 %v902_v41  ;;  %v2563_v22 = vadd.f32 %v2477_v12, %v2392_v17  ;;  %v2567_v14 = vadd.f32 %v2486_v19, %v2394_v2 }
 0x12d   : > { %1308 = vst [vmem:[%s2442_s6 + $0x78] sm:$0xff] %v1204_v57  ;;  %v1103_v7 = vadd.f32 1.0, %v1918_v1  ;;  %v1920_v8 = vpop.eup %1919  ;;  %v793_v29 = vmul.f32 0.5, %v2484_v15  ;;  %1937 = verf.f32 %v904_v21  ;;  %v2577_v11 = vadd.f32 %v2488_v20, %v2396_v18 }
 0x12e   : > { %v1205_v10 = vmul.f32 %v1101_v47, %v789_v3  ;;  %v1102_v42 = vadd.f32 1.0, %v1920_v8  ;;  %v1922_v27 = vpop.eup %1921  ;;  %v795_v34 = vmul.f32 0.5, %v2493_v23  ;;  %v905_v31 = vmul.f32 0.70710677, %v2559_v46 }
 0x12f   : > { %v1207_v52 = vmul.f32 %v1103_v7, %v791_v4  ;;  %v2569_v25 = vpop.f32.mrb[20].mxu0  ;;  %v2571_v26 = vpop.f32.mrb[20].mxu1  ;;  %v1104_v33 = vadd.f32 1.0, %v1922_v27  ;;  %v2586_v35 = vadd.f32 %v521_v43, %v2390_v16  ;;  %v794_v20 = vmul.f32 0.5, %v2497_v24 }
 0x130   : > { %1309 = vst [vmem:[%s2442_s6 + $0x80] sm:$0xff] %v1205_v10  ;;  %v1206_v28 = vmul.f32 %v1102_v42, %v790_v48  ;;  %v2579_v12 = vpop.f32.mrb[21].mxu0  ;;  %v2581_v30 = vpop.f32.mrb[21].mxu1  ;;  %v907_v62 = vmul.f32 0.70710677, %v2563_v22  ;;  %v796_v63 = vmul.f32 0.5, %v2515_v49  ;;  %1939 = verf.f32 %v905_v31 }
 0x131   : > { %1311 = vst [vmem:[%s2442_s6 + $0x90] sm:$0xff] %v1207_v52  ;;  %v1924_v19 = vpop.eup %1923  ;;  %v2588_v32 = vpop.f32.mrb[22].mxu0  ;;  %v906_v38 = vmul.f32 0.70710677, %v2567_v14  ;;  %v1208_v40 = vmul.f32 %v1104_v33, %v792_v13  ;;  %v908_v24 = vmul.f32 0.70710677, %v2577_v11  ;;  %v2608_v4 = vadd.f32 %v2510_v44, %v2392_v17 }
 0x132   : > { %v1926_v15 = vpop.eup %1925  ;;  %1310 = vst [vmem:[%s2442_s6 + $0x88] sm:$0xff] %v1206_v28  ;;  %v1105_v36 = vadd.f32 1.0, %v1924_v19  ;;  %v2595_v43 = vpop.f32.mrb[22].mxu1  ;;  %1941 = verf.f32 %v907_v62  ;;  %v797_v1 = vmul.f32 0.5, %v2524_v9  ;;  %v909_v49 = vmul.f32 0.70710677, %v2586_v35 }
 0x133   : > { %v1928_v39 = vpop.eup %1927  ;;  %v1107_v23 = vadd.f32 1.0, %v1926_v15  ;;  %v2597_v0 = vpop.f32.mrb[23].mxu0  ;;  %1312 = vst [vmem:[%s2442_s6 + $0x98] sm:$0xff] %v1208_v40  ;;  %1943 = verf.f32 %v906_v38  ;;  %v2612_v5 = vadd.f32 %v2517_v50, %v2394_v2  ;;  %v799_v9 = vmul.f32 0.5, %v2528_v53 }
 0x134   : > { %v1209_v45 = vmul.f32 %v1105_v36, %v793_v29  ;;  %v1106_v56 = vadd.f32 1.0, %v1928_v39  ;;  %v2600_v57 = vpop.f32.mrb[23].mxu1  ;;  %v1930_v3 = vpop.eup %1929  ;;  %1945 = verf.f32 %v908_v24  ;;  %v2618_v6 = vadd.f32 %v2519_v51, %v2396_v18 }
 0x135   : > { %v1211_v58 = vmul.f32 %v1107_v23, %v795_v34  ;;  %v1932_v7 = vpop.eup %1931  ;;  %v1108_v48 = vadd.f32 1.0, %v1930_v3  ;;  %1947 = verf.f32 %v909_v49  ;;  %v798_v50 = vmul.f32 0.5, %v2531_v54 }
 0x136   : > { %1313 = vst [vmem:[%s2442_s6 + $0xa0] sm:$0xff] %v1209_v45  ;;  %v1210_v47 = vmul.f32 %v1106_v56, %v794_v20  ;;  %v1934_v44 = vpop.eup %1933  ;;  %v1109_v13 = vadd.f32 1.0, %v1932_v7  ;;  %v911_v41 = vmul.f32 0.70710677, %v2608_v4  ;;  %v2629_v52 = vadd.f32 %v2533_v37, %v2390_v16 }
 0x137   : > { %1315 = vst [vmem:[%s2442_s6 + $0xb0] sm:$0xff] %v1211_v58  ;;  %v2620_v8 = vpop.f32.mrb[24].mxu0  ;;  %v2622_v10 = vpop.f32.mrb[24].mxu1  ;;  %v1212_v42 = vmul.f32 %v1108_v48, %v796_v63  ;;  %v1111_v21 = vadd.f32 1.0, %v1934_v44  ;;  %v800_v27 = vmul.f32 0.5, %v2541_v59  ;;  %v801_v20 = vmul.f32 0.5, %v2559_v46 }
 0x138   : > { %1314 = vst [vmem:[%s2442_s6 + $0xa8] sm:$0xff] %v1210_v47  ;;  %v2631_v53 = vpop.f32.mrb[25].mxu0  ;;  %v1936_v51 = vpop.eup %1935  ;;  %v910_v28 = vmul.f32 0.70710677, %v2612_v5  ;;  %v1213_v33 = vmul.f32 %v1109_v13, %v797_v1  ;;  %1949 = verf.f32 %v911_v41  ;;  %v912_v37 = vmul.f32 0.70710677, %v2618_v6 }
 0x139   : > { %v2635_v29 = vpop.f32.mrb[25].mxu1  ;;  %v2637_v54 = vpop.f32.mrb[26].mxu0  ;;  %v1110_v34 = vadd.f32 1.0, %v1936_v51  ;;  %1316 = vst [vmem:[%s2442_s6 + $0xb8] sm:$0xff] %v1212_v42  ;;  %v1215_v59 = vmul.f32 %v1111_v21, %v799_v9  ;;  %v913_v39 = vmul.f32 0.70710677, %v2629_v52  ;;  %v2652_v40 = vadd.f32 %v2535_v55, %v2392_v17 }
 0x13a   : > { %v1938_v19 = vpop.eup %1937  ;;  %v2640_v31 = vpop.f32.mrb[26].mxu1  ;;  %1951 = verf.f32 %v910_v28  ;;  %1317 = vst [vmem:[%s2442_s6 + $0xc0] sm:$0xff] %v1213_v33  ;;  %v803_v45 = vmul.f32 0.5, %v2563_v22  ;;  %v2658_v46 = vadd.f32 %v2543_v60, %v2394_v2  ;;  %v2662_v56 = vadd.f32 %v2545_v61, %v2396_v18 }
 0x13b   : > { %v2642_v15 = vpop.f32.mrb[27].mxu0  ;;  %v1112_v36 = vadd.f32 1.0, %v1938_v19  ;;  %v2646_v62 = vpop.f32.mrb[27].mxu1  ;;  %v1214_v38 = vmul.f32 %v1110_v34, %v798_v50  ;;  %1953 = verf.f32 %v912_v37  ;;  %1319 = vst [vmem:[%s2442_s6 + $0xd0] sm:$0xff] %v1215_v59  ;;  %v915_v55 = vmul.f32 0.70710677, %v2652_v40 }
 0x13c   : > { %v1940_v23 = vpop.eup %1939  ;;  %1955 = verf.f32 %v913_v39  ;;  %v2668_v1 = vadd.f32 %v2569_v25, %v2390_v16  ;;  %v802_v60 = vmul.f32 0.5, %v2567_v14  ;;  %v804_v3 = vmul.f32 0.5, %v2577_v11 }
 0x13d   : > { %v1216_v63 = vmul.f32 %v1112_v36, %v800_v27  ;;  %v1942_v24 = vpop.eup %1941  ;;  %1318 = vst [vmem:[%s2442_s6 + $0xc8] sm:$0xff] %v1214_v38  ;;  %v1113_v58 = vadd.f32 1.0, %v1940_v23  ;;  %v914_v61 = vmul.f32 0.70710677, %v2658_v46  ;;  %1957 = verf.f32 %v915_v55 }
 0x13e   : > { %v1944_v49 = vpop.eup %1943  ;;  %v1115_v22 = vadd.f32 1.0, %v1942_v24  ;;  %v916_v44 = vmul.f32 0.70710677, %v2662_v56  ;;  %v805_v11 = vmul.f32 0.5, %v2586_v35  ;;  %v917_v28 = vmul.f32 0.70710677, %v2668_v1 }
 0x13f   : > { %1320 = vst [vmem:[%s2442_s6 + $0xd8] sm:$0xff] %v1216_v63  ;;  %v2674_v47 = vpop.f32.mrb[28].mxu0  ;;  %v1946_v7 = vpop.eup %1945  ;;  %v1217_v48 = vmul.f32 %v1113_v58, %v801_v20  ;;  %v1114_v9 = vadd.f32 1.0, %v1944_v49  ;;  %1959 = verf.f32 %v914_v61  ;;  %v2695_v35 = vadd.f32 %v2571_v26, %v2392_v17 }
 0x140   : > { %v2677_v25 = vpop.f32.mrb[28].mxu1  ;;  %v2679_v13 = vpop.f32.mrb[29].mxu0  ;;  %v1219_v14 = vmul.f32 %v1115_v22, %v803_v45  ;;  %v1116_v41 = vadd.f32 1.0, %v1946_v7  ;;  %1961 = verf.f32 %v916_v44  ;;  %v2699_v37 = vadd.f32 %v2579_v12, %v2394_v2 }
 0x141   : > { %v1948_v50 = vpop.eup %1947  ;;  %v2682_v51 = vpop.f32.mrb[29].mxu1  ;;  %1321 = vst [vmem:[%s2442_s6 + $0xe0] sm:$0xff] %v1217_v48  ;;  %v1218_v21 = vmul.f32 %v1114_v9, %v802_v60  ;;  %v2703_v59 = vadd.f32 %v2581_v30, %v2396_v18  ;;  %v807_v39 = vmul.f32 0.5, %v2608_v4  ;;  %1963 = verf.f32 %v917_v28 }
 0x142   : > { %v2684_v42 = vpop.f32.mrb[30].mxu0  ;;  %v1117_v27 = vadd.f32 1.0, %v1948_v50  ;;  %v2688_v19 = vpop.f32.mrb[30].mxu1  ;;  %1323 = vst [vmem:[%s2442_s6 + $0xf0] sm:$0xff] %v1219_v14  ;;  %v1220_v34 = vmul.f32 %v1116_v41, %v804_v3  ;;  %v2711_v26 = vadd.f32 %v2588_v32, %v2390_v16  ;;  %v806_v63 = vmul.f32 0.5, %v2612_v5 }
 0x143   : > { %v2690_v33 = vpop.f32.mrb[31].mxu0  ;;  %v2705_v36 = vpop.f32.mrb[31].mxu1  ;;  %1322 = vst [vmem:[%s2442_s6 + $0xe8] sm:$0xff] %v1218_v21  ;;  %v919_v30 = vmul.f32 0.70710677, %v2695_v35  ;;  %v2718_v45 = vadd.f32 %v2595_v43, %v2392_v17  ;;  %v808_v4 = vmul.f32 0.5, %v2618_v6  ;;  %v2748_v21 = vadd.f32 %v2600_v57, %v2396_v18 }
 0x144   : > { %v1950_v20 = vpop.eup %1949  ;;  %v1221_v38 = vmul.f32 %v1117_v27, %v805_v11  ;;  %1324 = vst [vmem:[%s2442_s6 + $0xf8] sm:$0xff] %v1220_v34  ;;  %v918_v32 = vmul.f32 0.70710677, %v2699_v37  ;;  %v920_v55 = vmul.f32 0.70710677, %v2703_v59  ;;  %v809_v5 = vmul.f32 0.5, %v2629_v52 }
 0x145   : > { %v1952_v23 = vpop.eup %1951  ;;  %v1119_v12 = vadd.f32 1.0, %v1950_v20  ;;  %1965 = verf.f32 %v919_v30  ;;  %v811_v7 = vmul.f32 0.5, %v2652_v40  ;;  %v921_v6 = vmul.f32 0.70710677, %v2711_v26 }
 0x146   : > { %v1954_v24 = vpop.eup %1953  ;;  %1325 = vst [vmem:[%s2442_s6 + $0x100] sm:$0xff] %v1221_v38  ;;  %v1118_v58 = vadd.f32 1.0, %v1952_v23  ;;  %1967 = verf.f32 %v918_v32  ;;  %v923_v50 = vmul.f32 0.70710677, %v2718_v45  ;;  %v2744_v40 = vadd.f32 %v2597_v0, %v2394_v2 }
 0x147   : > { %v1223_v49 = vmul.f32 %v1119_v12, %v807_v39  ;;  %v1120_v22 = vadd.f32 1.0, %v1954_v24  ;;  %v2725_v60 = vpop.f32.mrb[32].mxu0  ;;  %v2727_v3 = vpop.f32.mrb[32].mxu1  ;;  %1969 = verf.f32 %v920_v55  ;;  %v2752_v27 = vadd.f32 %v2620_v8, %v2390_v16 }
 0x148   : > { %v1956_v43 = vpop.eup %1955  ;;  %v1222_v61 = vmul.f32 %v1118_v58, %v806_v63  ;;  %v2731_v48 = vpop.f32.mrb[33].mxu0  ;;  %1971 = verf.f32 %v921_v6  ;;  %v2761_v0 = vadd.f32 %v2622_v10, %v2392_v17  ;;  %v810_v23 = vmul.f32 0.5, %v2658_v46 }
 0x149   : > { %v2733_v9 = vpop.f32.mrb[33].mxu1  ;;  %1327 = vst [vmem:[%s2442_s6 + $0x110] sm:$0xff] %v1223_v49  ;;  %v1224_v52 = vmul.f32 %v1120_v22, %v808_v4  ;;  %v1121_v44 = vadd.f32 1.0, %v1956_v43  ;;  %v2737_v14 = vpop.f32.mrb[34].mxu0  ;;  %1973 = verf.f32 %v923_v50  ;;  %v812_v8 = vmul.f32 0.5, %v2662_v56 }
 0x14a   : > { %v2739_v41 = vpop.f32.mrb[34].mxu1  ;;  %v1958_v11 = vpop.eup %1957  ;;  %1326 = vst [vmem:[%s2442_s6 + $0x108] sm:$0xff] %v1222_v61  ;;  %v922_v63 = vmul.f32 0.70710677, %v2744_v40  ;;  %v813_v58 = vmul.f32 0.5, %v2668_v1  ;;  %v815_v55 = vmul.f32 0.5, %v2695_v35  ;;  %v2780_v1 = vadd.f32 %v2631_v53, %v2394_v2 }
 0x14b   : > { %v2754_v28 = vpop.f32.mrb[35].mxu0  ;;  %v2756_v34 = vpop.f32.mrb[35].mxu1  ;;  %1328 = vst [vmem:[%s2442_s6 + $0x118] sm:$0xff] %v1224_v52  ;;  %v1225_v38 = vmul.f32 %v1121_v44, %v809_v5  ;;  %v1123_v39 = vadd.f32 1.0, %v1958_v11  ;;  %v924_v4 = vmul.f32 0.70710677, %v2748_v21  ;;  %v2784_v35 = vadd.f32 %v2635_v29, %v2396_v18 }
 0x14c   : > { %v1960_v20 = vpop.eup %1959  ;;  %1975 = verf.f32 %v922_v63  ;;  %v925_v46 = vmul.f32 0.70710677, %v2752_v27  ;;  %v927_v22 = vmul.f32 0.70710677, %v2761_v0  ;;  %v2788_v61 = vadd.f32 %v2637_v54, %v2390_v16 }
 0x14d   : > { %v1962_v57 = vpop.eup %1961  ;;  %v1122_v12 = vadd.f32 1.0, %v1960_v20  ;;  %1329 = vst [vmem:[%s2442_s6 + $0x120] sm:$0xff] %v1225_v38  ;;  %v1227_v30 = vmul.f32 %v1123_v39, %v811_v7  ;;  %1977 = verf.f32 %v924_v4  ;;  %v814_v50 = vmul.f32 0.5, %v2699_v37 }
 0x14e   : > { %v1124_v24 = vadd.f32 1.0, %v1962_v57  ;;  %v1964_v32 = vpop.eup %1963  ;;  %1979 = verf.f32 %v925_v46  ;;  %v2798_v53 = vadd.f32 %v2640_v31, %v2392_v17  ;;  %v816_v38 = vmul.f32 0.5, %v2703_v59 }
 0x14f   : > { %v1226_v10 = vmul.f32 %v1122_v12, %v810_v23  ;;  %1331 = vst [vmem:[%s2442_s6 + $0x130] sm:$0xff] %v1227_v30  ;;  %v1125_v49 = vadd.f32 1.0, %v1964_v32  ;;  %v2773_v5 = vpop.f32.mrb[36].mxu0  ;;  %v2775_v43 = vpop.f32.mrb[36].mxu1  ;;  %1981 = verf.f32 %v927_v22  ;;  %v817_v39 = vmul.f32 0.5, %v2711_v26 }
 0x150   : > { %v1228_v56 = vmul.f32 %v1124_v24, %v812_v8  ;;  %v2790_v7 = vpop.f32.mrb[37].mxu0  ;;  %v2792_v6 = vpop.f32.mrb[37].mxu1  ;;  %v926_v57 = vmul.f32 0.70710677, %v2780_v1  ;;  %v928_v31 = vmul.f32 0.70710677, %v2784_v35  ;;  %v2814_v63 = vadd.f32 %v2642_v15, %v2394_v2 }
 0x151   : > { %1330 = vst [vmem:[%s2442_s6 + $0x128] sm:$0xff] %v1226_v10  ;;  %v1966_v52 = vpop.eup %1965  ;;  %v1229_v44 = vmul.f32 %v1125_v49, %v813_v58  ;;  %v2800_v29 = vpop.f32.mrb[38].mxu0  ;;  %v929_v8 = vmul.f32 0.70710677, %v2788_v61  ;;  %v819_v24 = vmul.f32 0.5, %v2718_v45  ;;  %v818_v49 = vmul.f32 0.5, %v2744_v40 }
 0x152   : > { %1332 = vst [vmem:[%s2442_s6 + $0x138] sm:$0xff] %v1228_v56  ;;  %v2802_v11 = vpop.f32.mrb[38].mxu1  ;;  %v1968_v54 = vpop.eup %1967  ;;  %v1127_v20 = vadd.f32 1.0, %v1966_v52  ;;  %1983 = verf.f32 %v926_v57  ;;  %v931_v46 = vmul.f32 0.70710677, %v2798_v53  ;;  %v2826_v22 = vadd.f32 %v2646_v62, %v2396_v18 }
 0x153   : > { %v2807_v23 = vpop.f32.mrb[39].mxu0  ;;  %v1970_v37 = vpop.eup %1969  ;;  %1333 = vst [vmem:[%s2442_s6 + $0x140] sm:$0xff] %v1229_v44  ;;  %v1126_v12 = vadd.f32 1.0, %v1968_v54  ;;  %1985 = verf.f32 %v928_v31  ;;  %v930_v45 = vmul.f32 0.70710677, %v2814_v63  ;;  %v820_v40 = vmul.f32 0.5, %v2748_v21 }
 0x154   : > { %v1972_v30 = vpop.eup %1971  ;;  %v1231_v59 = vmul.f32 %v1127_v20, %v815_v55  ;;  %v1128_v26 = vadd.f32 1.0, %v1970_v37  ;;  %v2817_v58 = vpop.f32.mrb[39].mxu1  ;;  %1987 = verf.f32 %v929_v8  ;;  %v2836_v20 = vadd.f32 %v2674_v47, %v2390_v16 }
 0x155   : > { %v1974_v4 = vpop.eup %1973  ;;  %v1230_v32 = vmul.f32 %v1126_v12, %v814_v50  ;;  %v1129_v10 = vadd.f32 1.0, %v1972_v30  ;;  %1989 = verf.f32 %v931_v46  ;;  %v932_v12 = vmul.f32 0.70710677, %v2826_v22 }
 0x156   : > { %1335 = vst [vmem:[%s2442_s6 + $0x150] sm:$0xff] %v1231_v59  ;;  %v1232_v56 = vmul.f32 %v1128_v26, %v816_v38  ;;  %v1131_v15 = vadd.f32 1.0, %v1974_v4  ;;  %v1976_v50 = vpop.eup %1975  ;;  %v2840_v38 = vadd.f32 %v2677_v25, %v2392_v17  ;;  %1991 = verf.f32 %v930_v45 }
 0x157   : > { %1334 = vst [vmem:[%s2442_s6 + $0x148] sm:$0xff] %v1230_v32  ;;  %v1233_v55 = vmul.f32 %v1129_v10, %v817_v39  ;;  %v2828_v52 = vpop.f32.mrb[40].mxu0  ;;  %v2830_v44 = vpop.f32.mrb[40].mxu1  ;;  %v1130_v37 = vadd.f32 1.0, %v1976_v50  ;;  %v2850_v21 = vadd.f32 %v2679_v13, %v2394_v2  ;;  %v821_v30 = vmul.f32 0.5, %v2752_v27 }
 0x158   : > { %1336 = vst [vmem:[%s2442_s6 + $0x158] sm:$0xff] %v1232_v56  ;;  %v1235_v54 = vmul.f32 %v1131_v15, %v819_v24  ;;  %v2842_v62 = vpop.f32.mrb[41].mxu0  ;;  %v2844_v39 = vpop.f32.mrb[41].mxu1  ;;  %v823_v59 = vmul.f32 0.5, %v2761_v0  ;;  %v933_v26 = vmul.f32 0.70710677, %v2836_v20  ;;  %1993 = verf.f32 %v932_v12 }
 0x159   : > { %v1978_v57 = vpop.eup %1977  ;;  %1337 = vst [vmem:[%s2442_s6 + $0x160] sm:$0xff] %v1233_v55  ;;  %v2852_v47 = vpop.f32.mrb[42].mxu0  ;;  %v1234_v13 = vmul.f32 %v1130_v37, %v818_v49  ;;  %v935_v10 = vmul.f32 0.70710677, %v2840_v38  ;;  %v822_v27 = vmul.f32 0.5, %v2780_v1  ;;  %v2870_v49 = vadd.f32 %v2682_v51, %v2396_v18 }
 0x15a   : > { %v2854_v31 = vpop.f32.mrb[42].mxu1  ;;  %v1980_v25 = vpop.eup %1979  ;;  %1339 = vst [vmem:[%s2442_s6 + $0x170] sm:$0xff] %v1235_v54  ;;  %v1132_v8 = vadd.f32 1.0, %v1978_v57  ;;  %1995 = verf.f32 %v933_v26  ;;  %v934_v55 = vmul.f32 0.70710677, %v2850_v21  ;;  %v824_v54 = vmul.f32 0.5, %v2784_v35 }
 0x15b   : > { %v2860_v24 = vpop.f32.mrb[43].mxu0  ;;  %v1982_v4 = vpop.eup %1981  ;;  %v1133_v32 = vadd.f32 1.0, %v1980_v25  ;;  %1338 = vst [vmem:[%s2442_s6 + $0x168] sm:$0xff] %v1234_v13  ;;  %1997 = verf.f32 %v935_v10  ;;  %v2880_v1 = vadd.f32 %v2688_v19, %v2392_v17  ;;  %v936_v51 = vmul.f32 0.70710677, %v2870_v49 }
 0x15c   : > { %v2863_v46 = vpop.f32.mrb[43].mxu1  ;;  %v1236_v56 = vmul.f32 %v1132_v8, %v820_v40  ;;  %v1135_v15 = vadd.f32 1.0, %v1982_v4  ;;  %v1984_v45 = vpop.eup %1983  ;;  %v2876_v40 = vadd.f32 %v2684_v42, %v2390_v16  ;;  %1999 = verf.f32 %v934_v55 }
 0x15d   : > { %v1237_v0 = vmul.f32 %v1133_v32, %v821_v30  ;;  %v1986_v57 = vpop.eup %1985  ;;  %v1134_v37 = vadd.f32 1.0, %v1984_v45  ;;  %v2886_v12 = vadd.f32 %v2690_v33, %v2394_v2  ;;  %v825_v19 = vmul.f32 0.5, %v2788_v61 }
 0x15e   : > { %1340 = vst [vmem:[%s2442_s6 + $0x178] sm:$0xff] %v1236_v56  ;;  %v1239_v50 = vmul.f32 %v1135_v15, %v823_v59  ;;  %v1988_v42 = vpop.eup %1987  ;;  %v1136_v8 = vadd.f32 1.0, %v1986_v57  ;;  %v827_v30 = vmul.f32 0.5, %v2798_v53  ;;  %v937_v59 = vmul.f32 0.70710677, %v2876_v40 }
 0x15f   : > { %1341 = vst [vmem:[%s2442_s6 + $0x180] sm:$0xff] %v1237_v0  ;;  %v2888_v25 = vpop.f32.mrb[44].mxu0  ;;  %v2890_v35 = vpop.f32.mrb[44].mxu1  ;;  %v1238_v13 = vmul.f32 %v1134_v37, %v822_v27  ;;  %v1137_v33 = vadd.f32 1.0, %v1988_v42  ;;  %2001 = verf.f32 %v936_v51  ;;  %v939_v32 = vmul.f32 0.70710677, %v2880_v1 }
 0x160   : > { %1343 = vst [vmem:[%s2442_s6 + $0x190] sm:$0xff] %v1239_v50  ;;  %v2896_v26 = vpop.f32.mrb[45].mxu0  ;;  %v1990_v4 = vpop.eup %1989  ;;  %v1240_v15 = vmul.f32 %v1136_v8, %v824_v54  ;;  %v826_v53 = vmul.f32 0.5, %v2814_v63  ;;  %2003 = verf.f32 %v937_v59  ;;  %v938_v50 = vmul.f32 0.70710677, %v2886_v12 }
 0x161   : > { %v2899_v10 = vpop.f32.mrb[45].mxu1  ;;  %v2901_v56 = vpop.f32.mrb[46].mxu0  ;;  %v1139_v61 = vadd.f32 1.0, %v1990_v4  ;;  %1342 = vst [vmem:[%s2442_s6 + $0x188] sm:$0xff] %v1238_v13  ;;  %v1241_v45 = vmul.f32 %v1137_v33, %v825_v19  ;;  %2005 = verf.f32 %v939_v32  ;;  %v2912_v57 = vadd.f32 %v2705_v36, %v2396_v18 }
 0x162   : > { %v2904_v0 = vpop.f32.mrb[46].mxu1  ;;  %v2906_v55 = vpop.f32.mrb[47].mxu0  ;;  %1344 = vst [vmem:[%s2442_s6 + $0x198] sm:$0xff] %v1240_v15  ;;  %v2919_v51 = vadd.f32 %v2725_v60, %v2390_v16  ;;  %v2923_v42 = vadd.f32 %v2727_v3, %v2392_v17  ;;  %v828_v19 = vmul.f32 0.5, %v2826_v22  ;;  %2007 = verf.f32 %v938_v50 }
 0x163   : > { %v1992_v27 = vpop.eup %1991  ;;  %v2914_v54 = vpop.f32.mrb[47].mxu1  ;;  %v1243_v63 = vmul.f32 %v1139_v61, %v827_v30  ;;  %1345 = vst [vmem:[%s2442_s6 + $0x1a0] sm:$0xff] %v1241_v45  ;;  %v940_v36 = vmul.f32 0.70710677, %v2912_v57  ;;  %v2930_v30 = vadd.f32 %v2731_v48, %v2394_v2  ;;  %v829_v13 = vmul.f32 0.5, %v2836_v20 }
 0x164   : > { %v1138_v37 = vadd.f32 1.0, %v1992_v27  ;;  %v1994_v8 = vpop.eup %1993  ;;  %v941_v3 = vmul.f32 0.70710677, %v2919_v51  ;;  %v831_v22 = vmul.f32 0.5, %v2840_v38  ;;  %v943_v15 = vmul.f32 0.70710677, %v2923_v42 }
 0x165   : > { %v1996_v59 = vpop.eup %1995  ;;  %1347 = vst [vmem:[%s2442_s6 + $0x1b0] sm:$0xff] %v1243_v63  ;;  %v1140_v4 = vadd.f32 1.0, %v1994_v8  ;;  %2009 = verf.f32 %v940_v36  ;;  %v830_v45 = vmul.f32 0.5, %v2850_v21  ;;  %v2950_v8 = vadd.f32 %v2733_v9, %v2396_v18 }
 0x166   : > { %v1242_v60 = vmul.f32 %v1138_v37, %v826_v53  ;;  %v1998_v33 = vpop.eup %1997  ;;  %v1141_v32 = vadd.f32 1.0, %v1996_v59  ;;  %2011 = verf.f32 %v941_v3  ;;  %v942_v37 = vmul.f32 0.70710677, %v2930_v30 }
 0x167   : > { %v2937_v61 = vpop.f32.mrb[48].mxu0  ;;  %v2939_v48 = vpop.f32.mrb[48].mxu1  ;;  %v1244_v27 = vmul.f32 %v1140_v4, %v828_v19  ;;  %v1143_v53 = vadd.f32 1.0, %v1998_v33  ;;  %2013 = verf.f32 %v943_v15  ;;  %v2963_v4 = vadd.f32 %v2739_v41, %v2392_v17 }
 0x168   : > { %1346 = vst [vmem:[%s2442_s6 + $0x1a8] sm:$0xff] %v1242_v60  ;;  %v2943_v20 = vpop.f32.mrb[49].mxu0  ;;  %v2945_v50 = vpop.f32.mrb[49].mxu1  ;;  %v1245_v63 = vmul.f32 %v1141_v32, %v829_v13  ;;  %v2959_v60 = vadd.f32 %v2737_v14, %v2390_v16  ;;  %v832_v33 = vmul.f32 0.5, %v2870_v49  ;;  %2015 = verf.f32 %v942_v37 }
 0x169   : > { %v2000_v38 = vpop.eup %1999  ;;  %v2952_v36 = vpop.f32.mrb[50].mxu0  ;;  %1348 = vst [vmem:[%s2442_s6 + $0x1b8] sm:$0xff] %v1244_v27  ;;  %v1247_v21 = vmul.f32 %v1143_v53, %v831_v22  ;;  %v944_v32 = vmul.f32 0.70710677, %v2950_v8  ;;  %v2974_v14 = vadd.f32 %v2754_v28, %v2394_v2  ;;  %v833_v27 = vmul.f32 0.5, %v2876_v40 }
 0x16a   : > { %v2954_v19 = vpop.f32.mrb[50].mxu1  ;;  %v1142_v59 = vadd.f32 1.0, %v2000_v38  ;;  %v2965_v13 = vpop.f32.mrb[51].mxu0  ;;  %1349 = vst [vmem:[%s2442_s6 + $0x1c0] sm:$0xff] %v1245_v63  ;;  %v945_v53 = vmul.f32 0.70710677, %v2959_v60 }
 0x16b   : > { %v2967_v9 = vpop.f32.mrb[51].mxu1  ;;  %v2002_v3 = vpop.eup %2001  ;;  %1351 = vst [vmem:[%s2442_s6 + $0x1d0] sm:$0xff] %v1247_v21  ;;  %v835_v49 = vmul.f32 0.5, %v2880_v1  ;;  %2017 = verf.f32 %v944_v32  ;;  %v947_v37 = vmul.f32 0.70710677, %v2963_v4  ;;  %v834_v21 = vmul.f32 0.5, %v2886_v12 }
 0x16c   : > { %3456 = vst [vmem:[#allocation3_spill] sm:$0xff] %v2967_v9  ;;  %v2004_v22 = vpop.eup %2003  ;;  %v1246_v41 = vmul.f32 %v1142_v59, %v830_v45  ;;  %v1144_v15 = vadd.f32 1.0, %v2002_v3  ;;  %2019 = verf.f32 %v945_v53  ;;  %v946_v40 = vmul.f32 0.70710677, %v2974_v14 }
 0x16d   : > { %v2006_v38 = vpop.eup %2005  ;;  %v1145_v63 = vadd.f32 1.0, %v2004_v22  ;;  %2021 = verf.f32 %v947_v37  ;;  %v2986_v3 = vadd.f32 %v2756_v34, %v2396_v18  ;;  %v2995_v12 = vadd.f32 %v2775_v43, %v2392_v17 }
 0x16e   : > { %1350 = vst [vmem:[%s2442_s6 + $0x1c8] sm:$0xff] %v1246_v41  ;;  %v1248_v28 = vmul.f32 %v1144_v15, %v832_v33  ;;  %v1147_v9 = vadd.f32 1.0, %v2006_v38  ;;  %v2008_v45 = vpop.eup %2007  ;;  %v2991_v33 = vadd.f32 %v2773_v5, %v2390_v16  ;;  %v836_v41 = vmul.f32 0.5, %v2912_v57 }
 0x16f   : > { %v1249_v59 = vmul.f32 %v1145_v63, %v833_v27  ;;  %v1146_v32 = vadd.f32 1.0, %v2008_v45  ;;  %v2010_v22 = vpop.eup %2009  ;;  %2023 = verf.f32 %v946_v40  ;;  %v948_v34 = vmul.f32 0.70710677, %v2986_v3 }
 0x170   : > { %1352 = vst [vmem:[%s2442_s6 + $0x1d8] sm:$0xff] %v1248_v28  ;;  %v1251_v1 = vmul.f32 %v1147_v9, %v835_v49  ;;  %v3002_v9 = vadd.f32 %v2790_v7, %v2394_v2  ;;  %v2012_v15 = vpop.eup %2011  ;;  %v1148_v27 = vadd.f32 1.0, %v2010_v22  ;;  %v837_v53 = vmul.f32 0.5, %v2919_v51 }
 0x171   : > { %1353 = vst [vmem:[%s2442_s6 + $0x1e0] sm:$0xff] %v1249_v59  ;;  %v1250_v5 = vmul.f32 %v1146_v32, %v834_v21  ;;  %v949_v43 = vmul.f32 0.70710677, %v2991_v33  ;;  %v2014_v38 = vpop.eup %2013  ;;  %v1149_v63 = vadd.f32 1.0, %v2012_v15  ;;  %v839_v57 = vmul.f32 0.5, %v2923_v42 }
 0x172   : > { %1355 = vst [vmem:[%s2442_s6 + $0x1f0] sm:$0xff] %v1251_v1  ;;  %2025 = verf.f32 %v948_v34  ;;  %v951_v49 = vmul.f32 0.70710677, %v2995_v12  ;;  %v1252_v7 = vmul.f32 %v1148_v27, %v836_v41  ;;  %v1151_v37 = vadd.f32 1.0, %v2014_v38  ;;  %v2016_v21 = vpop.eup %2015 }
 0x173   : > { %1354 = vst [vmem:[%s2442_s6 + $0x1e8] sm:$0xff] %v1250_v5  ;;  %v838_v28 = vmul.f32 0.5, %v2930_v30  ;;  %2027 = verf.f32 %v949_v43  ;;  %v1253_v45 = vmul.f32 %v1149_v63, %v837_v53  ;;  %v950_v51 = vmul.f32 0.70710677, %v3002_v9 }
 0x174   : > { %2029 = verf.f32 %v951_v49  ;;  %v3014_v59 = vadd.f32 %v2792_v6, %v2396_v18  ;;  %1356 = vst [vmem:[%s2442_s6 + $0x1f8] sm:$0xff] %v1252_v7  ;;  %v1255_v42 = vmul.f32 %v1151_v37, %v839_v57  ;;  %v1150_v40 = vadd.f32 1.0, %v2016_v21 }
 0x175   : > { %v3019_v1 = vadd.f32 %v2800_v29, %v2390_v16  ;;  %v3023_v30 = vadd.f32 %v2802_v11, %v2392_v17  ;;  %v2018_v32 = vpop.eup %2017  ;;  %1357 = vst [vmem:[%s2442_s6 + $0x200] sm:$0xff] %v1253_v45  ;;  %v840_v22 = vmul.f32 0.5, %v2950_v8  ;;  %2031 = verf.f32 %v950_v51 }
 0x176   : > { %v952_v6 = vmul.f32 0.70710677, %v3014_v59  ;;  %v3030_v41 = vadd.f32 %v2807_v23, %v2394_v2  ;;  %v2020_v34 = vpop.eup %2019  ;;  %1359 = vst [vmem:[%s2442_s6 + $0x210] sm:$0xff] %v1255_v42  ;;  %v1254_v29 = vmul.f32 %v1150_v40, %v838_v28  ;;  %v1152_v15 = vadd.f32 1.0, %v2018_v32 }
 0x177   : > { %v841_v5 = vmul.f32 0.5, %v2959_v60  ;;  %v953_v11 = vmul.f32 0.70710677, %v3019_v1  ;;  %v2022_v27 = vpop.eup %2021  ;;  %v1153_v53 = vadd.f32 1.0, %v2020_v34  ;;  %v843_v8 = vmul.f32 0.5, %v2963_v4 }
 0x178   : > { %2033 = verf.f32 %v952_v6  ;;  %v955_v43 = vmul.f32 0.70710677, %v3023_v30  ;;  %1358 = vst [vmem:[%s2442_s6 + $0x208] sm:$0xff] %v1254_v29  ;;  %v1256_v23 = vmul.f32 %v1152_v15, %v840_v22  ;;  %v1155_v38 = vadd.f32 1.0, %v2022_v27 }
 0x179   : > { %v842_v63 = vmul.f32 0.5, %v2974_v14  ;;  %2035 = verf.f32 %v953_v11  ;;  %v2024_v57 = vpop.eup %2023  ;;  %v1257_v49 = vmul.f32 %v1153_v53, %v841_v5  ;;  %v954_v60 = vmul.f32 0.70710677, %v3030_v41 }
 0x17a   : > { %2037 = verf.f32 %v955_v43  ;;  %v3042_v7 = vadd.f32 %v2817_v58, %v2396_v18  ;;  %1360 = vst [vmem:[%s2442_s6 + $0x218] sm:$0xff] %v1256_v23  ;;  %v1259_v4 = vmul.f32 %v1155_v38, %v843_v8  ;;  %v1154_v37 = vadd.f32 1.0, %v2024_v57 }
 0x17b   : > { %v3047_v28 = vadd.f32 %v2828_v52, %v2390_v16  ;;  %v3051_v14 = vadd.f32 %v2830_v44, %v2392_v17  ;;  %1361 = vst [vmem:[%s2442_s6 + $0x220] sm:$0xff] %v1257_v49  ;;  %v844_v45 = vmul.f32 0.5, %v2986_v3  ;;  %2039 = verf.f32 %v954_v60 }
 0x17c   : > { %v2026_v21 = vpop.eup %2025  ;;  %v956_v58 = vmul.f32 0.70710677, %v3042_v7  ;;  %v3058_v51 = vadd.f32 %v2842_v62, %v2394_v2  ;;  %1363 = vst [vmem:[%s2442_s6 + $0x230] sm:$0xff] %v1259_v4  ;;  %v1258_v52 = vmul.f32 %v1154_v37, %v842_v63  ;;  %v845_v32 = vmul.f32 0.5, %v2991_v33 }
 0x17d   : > { %v2028_v42 = vpop.eup %2027  ;;  %v1156_v40 = vadd.f32 1.0, %v2026_v21  ;;  %v957_v44 = vmul.f32 0.70710677, %v3047_v28  ;;  %v847_v3 = vmul.f32 0.5, %v2995_v12  ;;  %v959_v34 = vmul.f32 0.70710677, %v3051_v14 }
 0x17e   : > { %v2030_v22 = vpop.eup %2029  ;;  %v1157_v6 = vadd.f32 1.0, %v2028_v42  ;;  %2041 = verf.f32 %v956_v58  ;;  %1362 = vst [vmem:[%s2442_s6 + $0x228] sm:$0xff] %v1258_v52  ;;  %v846_v15 = vmul.f32 0.5, %v3002_v9  ;;  %v958_v33 = vmul.f32 0.70710677, %v3058_v51 }
 0x17f   : > { %v1260_v62 = vmul.f32 %v1156_v40, %v844_v45  ;;  %v1159_v29 = vadd.f32 1.0, %v2030_v22  ;;  %2043 = verf.f32 %v957_v44  ;;  %v2032_v5 = vpop.eup %2031  ;;  %v3070_v27 = vadd.f32 %v2844_v39, %v2396_v18 }
 0x180   : > { %v1261_v11 = vmul.f32 %v1157_v6, %v845_v32  ;;  %2045 = verf.f32 %v959_v34  ;;  %v1158_v53 = vadd.f32 1.0, %v2032_v5  ;;  %v3075_v8 = vadd.f32 %v2852_v47, %v2390_v16 }
 0x181   : > { %1364 = vst [vmem:[%s2442_s6 + $0x238] sm:$0xff] %v1260_v62  ;;  %v1263_v12 = vmul.f32 %v1159_v29, %v847_v3  ;;  %v3079_v9 = vadd.f32 %v2854_v31, %v2392_v17  ;;  %v848_v23 = vmul.f32 0.5, %v3014_v59  ;;  %2047 = verf.f32 %v958_v33 }
 0x182   : > { %v2034_v43 = vpop.eup %2033  ;;  %1365 = vst [vmem:[%s2442_s6 + $0x240] sm:$0xff] %v1261_v11  ;;  %v960_v39 = vmul.f32 0.70710677, %v3070_v27  ;;  %v3086_v38 = vadd.f32 %v2860_v24, %v2394_v2  ;;  %v1262_v47 = vmul.f32 %v1158_v53, %v846_v15  ;;  %v849_v49 = vmul.f32 0.5, %v3019_v1 }
 0x183   : > { %v2036_v63 = vpop.eup %2035  ;;  %1367 = vst [vmem:[%s2442_s6 + $0x250] sm:$0xff] %v1263_v12  ;;  %v1160_v57 = vadd.f32 1.0, %v2034_v43  ;;  %v961_v31 = vmul.f32 0.70710677, %v3075_v8  ;;  %v851_v59 = vmul.f32 0.5, %v3023_v30  ;;  %v850_v45 = vmul.f32 0.5, %v3030_v41 }
 0x184   : > { %v2038_v60 = vpop.eup %2037  ;;  %v1161_v4 = vadd.f32 1.0, %v2036_v63  ;;  %2049 = verf.f32 %v960_v39  ;;  %v963_v37 = vmul.f32 0.70710677, %v3079_v9  ;;  %1366 = vst [vmem:[%s2442_s6 + $0x248] sm:$0xff] %v1262_v47  ;;  %v962_v1 = vmul.f32 0.70710677, %v3086_v38 }
 0x185   : > { %v1264_v24 = vmul.f32 %v1160_v57, %v848_v23  ;;  %v1163_v21 = vadd.f32 1.0, %v2038_v60  ;;  %2051 = verf.f32 %v961_v31  ;;  %v2040_v58 = vpop.eup %2039  ;;  %v3098_v52 = vadd.f32 %v2863_v46, %v2396_v18 }
 0x186   : > { %v1265_v42 = vmul.f32 %v1161_v4, %v849_v49  ;;  %2053 = verf.f32 %v963_v37  ;;  %v1162_v40 = vadd.f32 1.0, %v2040_v58  ;;  %v3103_v32 = vadd.f32 %v2888_v25, %v2390_v16 }
 0x187   : > { %1368 = vst [vmem:[%s2442_s6 + $0x258] sm:$0xff] %v1264_v24  ;;  %v1267_v30 = vmul.f32 %v1163_v21, %v851_v59  ;;  %v3107_v41 = vadd.f32 %v2890_v35, %v2392_v17  ;;  %v852_v22 = vmul.f32 0.5, %v3042_v7  ;;  %2055 = verf.f32 %v962_v1 }
 0x188   : > { %v2042_v44 = vpop.eup %2041  ;;  %1369 = vst [vmem:[%s2442_s6 + $0x260] sm:$0xff] %v1265_v42  ;;  %v964_v46 = vmul.f32 0.70710677, %v3098_v52  ;;  %v3114_v6 = vadd.f32 %v2896_v26, %v2394_v2  ;;  %v1266_v25 = vmul.f32 %v1162_v40, %v850_v45  ;;  %v853_v62 = vmul.f32 0.5, %v3047_v28 }
 0x189   : > { %v2044_v3 = vpop.eup %2043  ;;  %1371 = vst [vmem:[%s2442_s6 + $0x270] sm:$0xff] %v1267_v30  ;;  %v1164_v34 = vadd.f32 1.0, %v2042_v44  ;;  %v965_v35 = vmul.f32 0.70710677, %v3103_v32  ;;  %v855_v7 = vmul.f32 0.5, %v3051_v14  ;;  %v854_v33 = vmul.f32 0.5, %v3058_v51 }
 0x18a   : > { %v2046_v29 = vpop.eup %2045  ;;  %v1165_v15 = vadd.f32 1.0, %v2044_v3  ;;  %2057 = verf.f32 %v964_v46  ;;  %v967_v5 = vmul.f32 0.70710677, %v3107_v41  ;;  %1370 = vst [vmem:[%s2442_s6 + $0x268] sm:$0xff] %v1266_v25  ;;  %v966_v28 = vmul.f32 0.70710677, %v3114_v6 }
 0x18b   : > { %v1268_v26 = vmul.f32 %v1164_v34, %v852_v22  ;;  %v1167_v11 = vadd.f32 1.0, %v2046_v29  ;;  %2059 = verf.f32 %v965_v35  ;;  %v2048_v12 = vpop.eup %2047  ;;  %v3126_v43 = vadd.f32 %v2899_v10, %v2396_v18 }
 0x18c   : > { %v1269_v53 = vmul.f32 %v1165_v15, %v853_v62  ;;  %2061 = verf.f32 %v967_v5  ;;  %v1166_v23 = vadd.f32 1.0, %v2048_v12  ;;  %v3131_v39 = vadd.f32 %v2901_v56, %v2390_v16 }
 0x18d   : > { %1372 = vst [vmem:[%s2442_s6 + $0x278] sm:$0xff] %v1268_v26  ;;  %v1271_v14 = vmul.f32 %v1167_v11, %v855_v7  ;;  %v3135_v51 = vadd.f32 %v2904_v0, %v2392_v17  ;;  %v856_v47 = vmul.f32 0.5, %v3070_v27  ;;  %2063 = verf.f32 %v966_v28 }
 0x18e   : > { %v2050_v63 = vpop.eup %2049  ;;  %1373 = vst [vmem:[%s2442_s6 + $0x280] sm:$0xff] %v1269_v53  ;;  %v968_v10 = vmul.f32 0.70710677, %v3126_v43  ;;  %v3142_v57 = vadd.f32 %v2906_v55, %v2394_v2  ;;  %v1270_v56 = vmul.f32 %v1166_v23, %v854_v33  ;;  %v857_v60 = vmul.f32 0.5, %v3075_v8 }
 0x18f   : > { %v2052_v49 = vpop.eup %2051  ;;  %1375 = vst [vmem:[%s2442_s6 + $0x290] sm:$0xff] %v1271_v14  ;;  %v1168_v31 = vadd.f32 1.0, %v2050_v63  ;;  %v969_v0 = vmul.f32 0.70710677, %v3131_v39  ;;  %v859_v27 = vmul.f32 0.5, %v3079_v9  ;;  %v858_v21 = vmul.f32 0.5, %v3086_v38 }
 0x190   : > { %v2054_v4 = vpop.eup %2053  ;;  %v1169_v59 = vadd.f32 1.0, %v2052_v49  ;;  %2065 = verf.f32 %v968_v10  ;;  %v971_v37 = vmul.f32 0.70710677, %v3135_v51  ;;  %1374 = vst [vmem:[%s2442_s6 + $0x288] sm:$0xff] %v1270_v56  ;;  %v970_v8 = vmul.f32 0.70710677, %v3142_v57 }
 0x191   : > { %v1272_v55 = vmul.f32 %v1168_v31, %v856_v47  ;;  %v1171_v24 = vadd.f32 1.0, %v2054_v4  ;;  %2067 = verf.f32 %v969_v0  ;;  %v2056_v45 = vpop.eup %2055  ;;  %v3154_v42 = vadd.f32 %v2914_v54, %v2396_v18  ;;  %v3457_v31 = vld [vmem:[#allocation3_spill] sm:$0xff] }
 0x192   : > { %v1273_v58 = vmul.f32 %v1169_v59, %v857_v60  ;;  %2069 = verf.f32 %v971_v37  ;;  %v1170_v1 = vadd.f32 1.0, %v2056_v45  ;;  %v3159_v30 = vadd.f32 %v2937_v61, %v2390_v16 }
 0x193   : > { %1376 = vst [vmem:[%s2442_s6 + $0x298] sm:$0xff] %v1272_v55  ;;  %v1275_v9 = vmul.f32 %v1171_v24, %v859_v27  ;;  %v3163_v38 = vadd.f32 %v2939_v48, %v2392_v17  ;;  %v860_v44 = vmul.f32 0.5, %v3098_v52  ;;  %2071 = verf.f32 %v970_v8 }
 0x194   : > { %v2058_v40 = vpop.eup %2057  ;;  %1377 = vst [vmem:[%s2442_s6 + $0x2a0] sm:$0xff] %v1273_v58  ;;  %v972_v54 = vmul.f32 0.70710677, %v3154_v42  ;;  %v3170_v22 = vadd.f32 %v2943_v20, %v2394_v2  ;;  %v1274_v61 = vmul.f32 %v1170_v1, %v858_v21  ;;  %v861_v25 = vmul.f32 0.5, %v3103_v32 }
 0x195   : > { %v2060_v46 = vpop.eup %2059  ;;  %1379 = vst [vmem:[%s2442_s6 + $0x2b0] sm:$0xff] %v1275_v9  ;;  %v1172_v3 = vadd.f32 1.0, %v2058_v40  ;;  %v973_v48 = vmul.f32 0.70710677, %v3159_v30  ;;  %v863_v52 = vmul.f32 0.5, %v3107_v41  ;;  %v862_v15 = vmul.f32 0.5, %v3114_v6 }
 0x196   : > { %v2062_v34 = vpop.eup %2061  ;;  %v1173_v62 = vadd.f32 1.0, %v2060_v46  ;;  %2073 = verf.f32 %v972_v54  ;;  %v975_v35 = vmul.f32 0.70710677, %v3163_v38  ;;  %1378 = vst [vmem:[%s2442_s6 + $0x2a8] sm:$0xff] %v1274_v61  ;;  %v974_v5 = vmul.f32 0.70710677, %v3170_v22 }
 0x197   : > { %v1276_v20 = vmul.f32 %v1172_v3, %v860_v44  ;;  %v1175_v29 = vadd.f32 1.0, %v2062_v34  ;;  %2075 = verf.f32 %v973_v48  ;;  %v2064_v7 = vpop.eup %2063  ;;  %v3182_v26 = vadd.f32 %v2945_v50, %v2396_v18 }
 0x198   : > { %v1277_v32 = vmul.f32 %v1173_v62, %v861_v25  ;;  %2077 = verf.f32 %v975_v35  ;;  %v1174_v11 = vadd.f32 1.0, %v2064_v7  ;;  %v606_v33 = vadd.f32 %v2952_v36, %v2390_v16 }
 0x199   : > { %1380 = vst [vmem:[%s2442_s6 + $0x2b8] sm:$0xff] %v1276_v20  ;;  %v1279_v41 = vmul.f32 %v1175_v29, %v863_v52  ;;  %v3189_v6 = vadd.f32 %v2954_v19, %v2392_v17  ;;  %2079 = verf.f32 %v974_v5  ;;  %v976_v53 = vmul.f32 0.70710677, %v3182_v26 }
 0x19a   : > { %v2066_v12 = vpop.eup %2065  ;;  %1381 = vst [vmem:[%s2442_s6 + $0x2c0] sm:$0xff] %v1277_v32  ;;  %v3195_v50 = vadd.f32 %v2965_v13, %v2394_v2  ;;  %v1278_v14 = vmul.f32 %v1174_v11, %v862_v15  ;;  %v864_v23 = vmul.f32 0.5, %v3126_v43  ;;  %v977_v36 = vmul.f32 0.70710677, %v606_v33 }
 0x19b   : > { %v2068_v28 = vpop.eup %2067  ;;  %1383 = vst [vmem:[%s2442_s6 + $0x2d0] sm:$0xff] %v1279_v41  ;;  %v1176_v16 = vadd.f32 1.0, %v2066_v12  ;;  %v865_v19 = vmul.f32 0.5, %v3131_v39  ;;  %2081 = verf.f32 %v976_v53  ;;  %v979_v47 = vmul.f32 0.70710677, %v3189_v6 }
 0x19c   : > { %v2070_v17 = vpop.eup %2069  ;;  %v1177_v63 = vadd.f32 1.0, %v2068_v28  ;;  %1382 = vst [vmem:[%s2442_s6 + $0x2c8] sm:$0xff] %v1278_v14  ;;  %v867_v2 = vmul.f32 0.5, %v3135_v51  ;;  %2083 = verf.f32 %v977_v36  ;;  %v978_v56 = vmul.f32 0.70710677, %v3195_v50 }
 0x19d   : > { %v1280_v10 = vmul.f32 %v1176_v16, %v864_v23  ;;  %v1179_v13 = vadd.f32 1.0, %v2070_v17  ;;  %v2072_v49 = vpop.eup %2071  ;;  %2085 = verf.f32 %v979_v47  ;;  %v771_v39 = vadd.f32 %v3457_v31, %v2396_v18 }
 0x19e   : > { %v1281_v43 = vmul.f32 %v1177_v63, %v865_v19  ;;  %v866_v0 = vmul.f32 0.5, %v3142_v57  ;;  %v1178_v4 = vadd.f32 1.0, %v2072_v49  ;;  %2087 = verf.f32 %v978_v56 }
 0x19f   : > { %1384 = vst [vmem:[%s2442_s6 + $0x2d8] sm:$0xff] %v1280_v10  ;;  %v1283_v60 = vmul.f32 %v1179_v13, %v867_v2  ;;  %v980_v51 = vmul.f32 0.70710677, %v771_v39  ;;  %v868_v55 = vmul.f32 0.5, %v3154_v42  ;;  %v869_v18 = vmul.f32 0.5, %v3159_v30 }
 0x1a0   : > { %v2074_v59 = vpop.eup %2073  ;;  %1385 = vst [vmem:[%s2442_s6 + $0x2e0] sm:$0xff] %v1281_v43  ;;  %v1282_v37 = vmul.f32 %v1178_v4, %v866_v0  ;;  %v871_v58 = vmul.f32 0.5, %v3163_v38  ;;  %v870_v42 = vmul.f32 0.5, %v3170_v22  ;;  %v872_v61 = vmul.f32 0.5, %v3182_v26 }
 0x1a1   : > { %v2076_v27 = vpop.eup %2075  ;;  %1387 = vst [vmem:[%s2442_s6 + $0x2f0] sm:$0xff] %v1283_v60  ;;  %v1180_v24 = vadd.f32 1.0, %v2074_v59  ;;  %2089 = verf.f32 %v980_v51  ;;  %v873_v25 = vmul.f32 0.5, %v606_v33  ;;  %v875_v22 = vmul.f32 0.5, %v3189_v6 }
 0x1a2   : > { %v2078_v21 = vpop.eup %2077  ;;  %v1181_v45 = vadd.f32 1.0, %v2076_v27  ;;  %1386 = vst [vmem:[%s2442_s6 + $0x2e8] sm:$0xff] %v1282_v37  ;;  %v874_v29 = vmul.f32 0.5, %v3195_v50  ;;  %v876_v5 = vmul.f32 0.5, %v771_v39 }
 0x1a3   : > { %v1284_v57 = vmul.f32 %v1180_v24, %v868_v55  ;;  %v1183_v8 = vadd.f32 1.0, %v2078_v21  ;;  %v2080_v9 = vpop.eup %2079 }
 0x1a4   : > { %v1285_v1 = vmul.f32 %v1181_v45, %v869_v18  ;;  %v1182_v44 = vadd.f32 1.0, %v2080_v9 }
 0x1a5   : > { %1388 = vst [vmem:[%s2442_s6 + $0x2f8] sm:$0xff] %v1284_v57  ;;  %v1287_v40 = vmul.f32 %v1183_v8, %v871_v58  ;;  %v2082_v54 = vpop.eup %2081 }
 0x1a6   : > { %1389 = vst [vmem:[%s2442_s6 + $0x300] sm:$0xff] %v1285_v1  ;;  %v2084_v30 = vpop.eup %2083  ;;  %v1286_v46 = vmul.f32 %v1182_v44, %v870_v42  ;;  %v1184_v3 = vadd.f32 1.0, %v2082_v54 }
 0x1a7   : > { %1391 = vst [vmem:[%s2442_s6 + $0x310] sm:$0xff] %v1287_v40  ;;  %v2086_v38 = vpop.eup %2085  ;;  %v1185_v48 = vadd.f32 1.0, %v2084_v30 }
 0x1a8   : > { %1390 = vst [vmem:[%s2442_s6 + $0x308] sm:$0xff] %v1286_v46  ;;  %v1288_v34 = vmul.f32 %v1184_v3, %v872_v61  ;;  %v1187_v62 = vadd.f32 1.0, %v2086_v38  ;;  %v2088_v52 = vpop.eup %2087 }
 0x1a9   : > { %v1289_v35 = vmul.f32 %v1185_v48, %v873_v25  ;;  %v1186_v15 = vadd.f32 1.0, %v2088_v52 }
 0x1aa   : > { %1392 = vst [vmem:[%s2442_s6 + $0x318] sm:$0xff] %v1288_v34  ;;  %v1291_v20 = vmul.f32 %v1187_v62, %v875_v22  ;;  %1403 = sbr.rel (!%p2225_p4) target bundleno = 505 (0x1f9), region = 36 }
 0x1ab   : > { %v2090_v7 = vpop.eup %2089  ;;  %1393 = vst [vmem:[%s2442_s6 + $0x320] sm:$0xff] %v1289_v35  ;;  %v1290_v32 = vmul.f32 %v1186_v15, %v874_v29 }
 0x1ac   : > { %1395 = vst [vmem:[%s2442_s6 + $0x330] sm:$0xff] %v1291_v20  ;;  %v1188_v26 = vadd.f32 1.0, %v2090_v7 }
 0x1ad   : > { %1394 = vst [vmem:[%s2442_s6 + $0x328] sm:$0xff] %v1290_v32 }
 0x1ae   : > { %v1292_v41 = vmul.f32 %v1188_v26, %v876_v5 }
 0x1b0   : > { %1396 = vst [vmem:[%s2442_s6 + $0x338] sm:$0xff] %v1292_v41 }
 0x1b1   : > { %s3469_s7 = smov (!%p1406_p8, %s1405_s7), 26 }
 0x1b2   : > { %s1739_s14 = sshll.u32 %s3469_s7, 9 }
 0x1b3   : > { %p1727_p9 = scmp.eq.s32.totalorder %s1739_s14, 0 }
 0x1b4   : > { %s3240_s17 = sshrl.u32 (!%p1727_p9), %s3469_s7, 4 }
 0x1b5   : > { %1416 = sbr.rel (%p1727_p9) target bundleno = 505 (0x1f9), region = 40  ;;  %p1728_p10 = scmp.le.s32.totalorder (!%p1727_p9), %s3240_s17, 0 }
 0x1bc   : > { %1641 = sbr.rel (%p1728_p10) target bundleno = 484 (0x1e4), region = 88  ;;  %s3458_s15 = smov (!%p1728_p10), %s3234_s11 }
 0x1bd   : > { %s3459_s20 = smov (!%p1728_p10), %s2442_s6  ;;  %s3249_s28 = smov (!%p1728_p10), 0  }
 0x1be   : > { %s3251_s18 = smov (!%p1728_p10), 0  }
 0x1c3 LB: >> { %v1429_v11 = vld [vmem:[%s2153_s20] sm:$0xff]  ;;  %s1557_s21 = sadd.s32 1, %s2157_s28  ;;  %v1461_v2 = vld [vmem:[%s2153_s20 + $0x8] sm:$0xff]  ;;  %v1493_v21 = vld [vmem:[%s2153_s20 + $0x10] sm:$0xff]  ;;  %s1423_s18 = sadd.s32 1, %s2161_s18   ;;  %s2161_s18 = sphi %s3251_s18, %s1423_s18   ;;  %s2157_s28 = sphi %s3249_s28, %s3462_s28   ;;  %s2153_s20 = sphi %s3459_s20, %s3461_s20   ;;  %s2149_s15 = sphi %s3458_s15, %s3460_s15  }
 0x1c4   : >> { %v1431_v33 = vld [vmem:[%s2153_s20 + $0x20] sm:$0xff]  ;;  %1430 = vst [vmem:[%s2149_s15] sm:$0xff] %v1429_v11  ;;  %p1558_p11 = scmp.ge.s32.totalorder %s1557_s21, %s3240_s17  ;;  %v1463_v13 = vld [vmem:[%s2153_s20 + $0x28] sm:$0xff]  ;;  %1462 = vst [vmem:[%s2149_s15 + $0x8] sm:$0xff] %v1461_v2  ;;  %p1422_p12 = scmp.ge.s32.totalorder %s1423_s18, %s3240_s17 }
 0x1c5   : >> { %v1433_v6 = vld [vmem:[%s2153_s20 + $0x40] sm:$0xff]  ;;  %1432 = vst [vmem:[%s2149_s15 + $0x20] sm:$0xff] %v1431_v33  ;;  %1464 = vst [vmem:[%s2149_s15 + $0x28] sm:$0xff] %v1463_v13  ;;  %v1465_v49 = vld [vmem:[%s2153_s20 + $0x48] sm:$0xff] }
 0x1c6   : >> { %1434 = vst [vmem:[%s2149_s15 + $0x40] sm:$0xff] %v1433_v6  ;;  %v1435_v12 = vld [vmem:[%s2153_s20 + $0x60] sm:$0xff]  ;;  %s3471_s21 = smov (%p1558_p11, %s1557_s21), 0  ;;  %v1467_v43 = vld [vmem:[%s2153_s20 + $0x68] sm:$0xff]  ;;  %1466 = vst [vmem:[%s2149_s15 + $0x48] sm:$0xff] %v1465_v49 }
 0x1c7   : >> { %v1437_v53 = vld [vmem:[%s2153_s20 + $0x80] sm:$0xff]  ;;  %1436 = vst [vmem:[%s2149_s15 + $0x60] sm:$0xff] %v1435_v12  ;;  %s1729_s22 = sshll.u32 %s3471_s21, 9  ;;  %v1469_v56 = vld [vmem:[%s2153_s20 + $0x88] sm:$0xff]  ;;  %1468 = vst [vmem:[%s2149_s15 + $0x68] sm:$0xff] %v1467_v43  ;;  %s3462_s28 = smov %s3471_s21 }
 0x1c8   : >> { %v1439_v50 = vld [vmem:[%s2153_s20 + $0xa0] sm:$0xff]  ;;  %1438 = vst [vmem:[%s2149_s15 + $0x80] sm:$0xff] %v1437_v53  ;;  %s3307_s23 = scalar_lea.vmem %s2442_s6, %s1729_s22 [#allocation2]   ;;  %s3310_s24 = scalar_lea.vmem %s3234_s11, %s1729_s22   ;;  %1470 = vst [vmem:[%s2149_s15 + $0x88] sm:$0xff] %v1469_v56  ;;  %v1471_v31 = vld [vmem:[%s2153_s20 + $0xa8] sm:$0xff] }
 0x1c9   : >> { %1440 = vst [vmem:[%s2149_s15 + $0xa0] sm:$0xff] %v1439_v50  ;;  %v1441_v28 = vld [vmem:[%s2153_s20 + $0xc0] sm:$0xff]  ;;  %v1473_v39 = vld [vmem:[%s2153_s20 + $0xc8] sm:$0xff]  ;;  %1472 = vst [vmem:[%s2149_s15 + $0xa8] sm:$0xff] %v1471_v31 }
 0x1ca   : >> { %v1443_v14 = vld [vmem:[%s2153_s20 + $0xe0] sm:$0xff]  ;;  %1442 = vst [vmem:[%s2149_s15 + $0xc0] sm:$0xff] %v1441_v28  ;;  %v1475_v60 = vld [vmem:[%s2153_s20 + $0xe8] sm:$0xff]  ;;  %1474 = vst [vmem:[%s2149_s15 + $0xc8] sm:$0xff] %v1473_v39 }
 0x1cb   : >> { %v1445_v23 = vld [vmem:[%s2153_s20 + $0x100] sm:$0xff]  ;;  %1444 = vst [vmem:[%s2149_s15 + $0xe0] sm:$0xff] %v1443_v14  ;;  %1476 = vst [vmem:[%s2149_s15 + $0xe8] sm:$0xff] %v1475_v60  ;;  %v1477_v0 = vld [vmem:[%s2153_s20 + $0x108] sm:$0xff] }
 0x1cc   : >> { %1446 = vst [vmem:[%s2149_s15 + $0x100] sm:$0xff] %v1445_v23  ;;  %v1447_v16 = vld [vmem:[%s2153_s20 + $0x120] sm:$0xff]  ;;  %v1479_v4 = vld [vmem:[%s2153_s20 + $0x128] sm:$0xff]  ;;  %1478 = vst [vmem:[%s2149_s15 + $0x108] sm:$0xff] %v1477_v0 }
 0x1cd   : >> { %v1449_v36 = vld [vmem:[%s2153_s20 + $0x140] sm:$0xff]  ;;  %1448 = vst [vmem:[%s2149_s15 + $0x120] sm:$0xff] %v1447_v16  ;;  %v1481_v59 = vld [vmem:[%s2153_s20 + $0x148] sm:$0xff]  ;;  %1480 = vst [vmem:[%s2149_s15 + $0x128] sm:$0xff] %v1479_v4 }
 0x1ce   : >> { %v1451_v17 = vld [vmem:[%s2153_s20 + $0x160] sm:$0xff]  ;;  %1450 = vst [vmem:[%s2149_s15 + $0x140] sm:$0xff] %v1449_v36  ;;  %1482 = vst [vmem:[%s2149_s15 + $0x148] sm:$0xff] %v1481_v59  ;;  %v1483_v51 = vld [vmem:[%s2153_s20 + $0x168] sm:$0xff] }
 0x1cf   : >> { %1452 = vst [vmem:[%s2149_s15 + $0x160] sm:$0xff] %v1451_v17  ;;  %v1453_v19 = vld [vmem:[%s2153_s20 + $0x180] sm:$0xff]  ;;  %v1485_v27 = vld [vmem:[%s2153_s20 + $0x188] sm:$0xff]  ;;  %1484 = vst [vmem:[%s2149_s15 + $0x168] sm:$0xff] %v1483_v51 }
 0x1d0   : >> { %v1455_v63 = vld [vmem:[%s2153_s20 + $0x1a0] sm:$0xff]  ;;  %1454 = vst [vmem:[%s2149_s15 + $0x180] sm:$0xff] %v1453_v19  ;;  %v1487_v37 = vld [vmem:[%s2153_s20 + $0x1a8] sm:$0xff]  ;;  %1486 = vst [vmem:[%s2149_s15 + $0x188] sm:$0xff] %v1485_v27 }
 0x1d1   : >> { %v1457_v47 = vld [vmem:[%s2153_s20 + $0x1c0] sm:$0xff]  ;;  %1456 = vst [vmem:[%s2149_s15 + $0x1a0] sm:$0xff] %v1455_v63  ;;  %1488 = vst [vmem:[%s2149_s15 + $0x1a8] sm:$0xff] %v1487_v37  ;;  %v1489_v55 = vld [vmem:[%s2153_s20 + $0x1c8] sm:$0xff] }
 0x1d2   : >> { %1458 = vst [vmem:[%s2149_s15 + $0x1c0] sm:$0xff] %v1457_v47  ;;  %v1459_v10 = vld [vmem:[%s2153_s20 + $0x1e0] sm:$0xff]  ;;  %v1491_v24 = vld [vmem:[%s2153_s20 + $0x1e8] sm:$0xff]  ;;  %1490 = vst [vmem:[%s2149_s15 + $0x1c8] sm:$0xff] %v1489_v55 }
 0x1d3   : >> { %1460 = vst [vmem:[%s2149_s15 + $0x1e0] sm:$0xff] %v1459_v10  ;;  %1492 = vst [vmem:[%s2149_s15 + $0x1e8] sm:$0xff] %v1491_v24  ;;  %v1495_v18 = vld [vmem:[%s2153_s20 + $0x30] sm:$0xff]  ;;  %v1525_v38 = vld [vmem:[%s2153_s20 + $0x18] sm:$0xff] }
 0x1d4   : >> { %1494 = vst [vmem:[%s2149_s15 + $0x10] sm:$0xff] %v1493_v21  ;;  %v1497_v45 = vld [vmem:[%s2153_s20 + $0x50] sm:$0xff]  ;;  %1496 = vst [vmem:[%s2149_s15 + $0x30] sm:$0xff] %v1495_v18  ;;  %v1527_v25 = vld [vmem:[%s2153_s20 + $0x38] sm:$0xff] }
 0x1d5   : >> { %v1499_v57 = vld [vmem:[%s2153_s20 + $0x70] sm:$0xff]  ;;  %1498 = vst [vmem:[%s2149_s15 + $0x50] sm:$0xff] %v1497_v45  ;;  %v1529_v48 = vld [vmem:[%s2153_s20 + $0x58] sm:$0xff]  ;;  %1526 = vst [vmem:[%s2149_s15 + $0x18] sm:$0xff] %v1525_v38 }
 0x1d6   : >> { %1500 = vst [vmem:[%s2149_s15 + $0x70] sm:$0xff] %v1499_v57  ;;  %v1501_v58 = vld [vmem:[%s2153_s20 + $0x90] sm:$0xff]  ;;  %1528 = vst [vmem:[%s2149_s15 + $0x38] sm:$0xff] %v1527_v25  ;;  %v1531_v34 = vld [vmem:[%s2153_s20 + $0x78] sm:$0xff] }
 0x1d7   : >> { %v1503_v8 = vld [vmem:[%s2153_s20 + $0xb0] sm:$0xff]  ;;  %1502 = vst [vmem:[%s2149_s15 + $0x90] sm:$0xff] %v1501_v58  ;;  %1530 = vst [vmem:[%s2149_s15 + $0x58] sm:$0xff] %v1529_v48  ;;  %v1533_v22 = vld [vmem:[%s2153_s20 + $0x98] sm:$0xff] }
 0x1d8   : >> { %v1505_v9 = vld [vmem:[%s2153_s20 + $0xd0] sm:$0xff]  ;;  %1504 = vst [vmem:[%s2149_s15 + $0xb0] sm:$0xff] %v1503_v8  ;;  %v1535_v62 = vld [vmem:[%s2153_s20 + $0xb8] sm:$0xff]  ;;  %1532 = vst [vmem:[%s2149_s15 + $0x78] sm:$0xff] %v1531_v34 }
 0x1d9   : >> { %1506 = vst [vmem:[%s2149_s15 + $0xd0] sm:$0xff] %v1505_v9  ;;  %v1507_v1 = vld [vmem:[%s2153_s20 + $0xf0] sm:$0xff]  ;;  %1534 = vst [vmem:[%s2149_s15 + $0x98] sm:$0xff] %v1533_v22  ;;  %v1537_v52 = vld [vmem:[%s2153_s20 + $0xd8] sm:$0xff] }
 0x1da   : >> { %v1509_v40 = vld [vmem:[%s2153_s20 + $0x110] sm:$0xff]  ;;  %1508 = vst [vmem:[%s2149_s15 + $0xf0] sm:$0xff] %v1507_v1  ;;  %1536 = vst [vmem:[%s2149_s15 + $0xb8] sm:$0xff] %v1535_v62  ;;  %v1539_v35 = vld [vmem:[%s2153_s20 + $0xf8] sm:$0xff] }
 0x1db   : >> { %v1511_v42 = vld [vmem:[%s2153_s20 + $0x130] sm:$0xff]  ;;  %1510 = vst [vmem:[%s2149_s15 + $0x110] sm:$0xff] %v1509_v40  ;;  %v1541_v20 = vld [vmem:[%s2153_s20 + $0x118] sm:$0xff]  ;;  %1538 = vst [vmem:[%s2149_s15 + $0xd8] sm:$0xff] %v1537_v52 }
 0x1dc   : >> { %1512 = vst [vmem:[%s2149_s15 + $0x130] sm:$0xff] %v1511_v42  ;;  %v1513_v44 = vld [vmem:[%s2153_s20 + $0x150] sm:$0xff]  ;;  %1540 = vst [vmem:[%s2149_s15 + $0xf8] sm:$0xff] %v1539_v35  ;;  %v1543_v29 = vld [vmem:[%s2153_s20 + $0x138] sm:$0xff] }
 0x1dd   : >> { %v1515_v54 = vld [vmem:[%s2153_s20 + $0x170] sm:$0xff]  ;;  %1514 = vst [vmem:[%s2149_s15 + $0x150] sm:$0xff] %v1513_v44  ;;  %1542 = vst [vmem:[%s2149_s15 + $0x118] sm:$0xff] %v1541_v20  ;;  %v1545_v15 = vld [vmem:[%s2153_s20 + $0x158] sm:$0xff]  ;;  %1425 = sbr.rel (!%p1422_p12) target bundleno = 451 (0x1c3), region = 94 }
 0x1de   : >> { %v1517_v30 = vld [vmem:[%s2153_s20 + $0x190] sm:$0xff]  ;;  %1516 = vst [vmem:[%s2149_s15 + $0x170] sm:$0xff] %v1515_v54  ;;  %v1547_v7 = vld [vmem:[%s2153_s20 + $0x178] sm:$0xff]  ;;  %1544 = vst [vmem:[%s2149_s15 + $0x138] sm:$0xff] %v1543_v29 }
 0x1df   : >> { %1518 = vst [vmem:[%s2149_s15 + $0x190] sm:$0xff] %v1517_v30  ;;  %v1519_v46 = vld [vmem:[%s2153_s20 + $0x1b0] sm:$0xff]  ;;  %1546 = vst [vmem:[%s2149_s15 + $0x158] sm:$0xff] %v1545_v15  ;;  %v1549_v32 = vld [vmem:[%s2153_s20 + $0x198] sm:$0xff] }
 0x1e0   : >> { %v1521_v61 = vld [vmem:[%s2153_s20 + $0x1d0] sm:$0xff]  ;;  %1520 = vst [vmem:[%s2149_s15 + $0x1b0] sm:$0xff] %v1519_v46  ;;  %1548 = vst [vmem:[%s2149_s15 + $0x178] sm:$0xff] %v1547_v7  ;;  %v1551_v5 = vld [vmem:[%s2153_s20 + $0x1b8] sm:$0xff] }
 0x1e1   : >> { %v1523_v3 = vld [vmem:[%s2153_s20 + $0x1f0] sm:$0xff]  ;;  %1522 = vst [vmem:[%s2149_s15 + $0x1d0] sm:$0xff] %v1521_v61  ;;  %v1553_v26 = vld [vmem:[%s2153_s20 + $0x1d8] sm:$0xff]  ;;  %1550 = vst [vmem:[%s2149_s15 + $0x198] sm:$0xff] %v1549_v32 }
 0x1e2   : >> { %1524 = vst [vmem:[%s2149_s15 + $0x1f0] sm:$0xff] %v1523_v3  ;;  %1552 = vst [vmem:[%s2149_s15 + $0x1b8] sm:$0xff] %v1551_v5  ;;  %v1555_v41 = vld [vmem:[%s2153_s20 + $0x1f8] sm:$0xff]  ;;  %s3461_s20 = smov %s3307_s23 }
 0x1e3   : >> { %1554 = vst [vmem:[%s2149_s15 + $0x1d8] sm:$0xff] %v1553_v26  ;;  %1556 = vst [vmem:[%s2149_s15 + $0x1f8] sm:$0xff] %v1555_v41  ;;  %s3460_s15 = smov %s3310_s24 }
 0x1e4 PF: > { %s3415_s25 = sand.u32 15, %s3469_s7   ;;  %s1742_s26 = sshll.u32 %s3240_s17, 9 }
 0x1e5   : > { %s3419_s27 = scalar_lea.vmem %s2442_s6, %s1742_s26 [#allocation2]   ;;  %s3422_s29 = scalar_lea.vmem %s3234_s11, %s1742_s26  }
 0x1e6   : > { %p1734_p13 = scmp.le.s32.totalorder %s3415_s25, 0 }
 0x1e7   : > { %s3463_s30 = smov (!%p1734_p13), %s3422_s29  ;;  %s3464_s4 = smov (!%p1734_p13), %s3419_s27 }
 0x1e8   : > { %1655 = sbr.rel (%p1734_p13) target bundleno = 505 (0x1f9), region = 99  ;;  %s2171_s5 = smov (!%p1734_p13), 0  }
 0x1e9   : > { %s2175_s12 = smov (!%p1734_p13), 0  }
 0x1ef LB: >> { %v1580_v11 = vld [vmem:[%s2169_s4] sm:$0xff]  ;;  %v1582_v33 = vld [vmem:[%s2169_s4 + $0x8] sm:$0xff]  ;;  %v1584_v6 = vld [vmem:[%s2169_s4 + $0x10] sm:$0xff]  ;;  %s1588_s6 = sadd.s32 1, %s2173_s5  ;;  %s1574_s12 = sadd.s32 1, %s2177_s12   ;;  %s2177_s12 = sphi %s2175_s12, %s1574_s12   ;;  %s2173_s5 = sphi %s2171_s5, %s2172_s5   ;;  %s2169_s4 = sphi %s3464_s4, %s1593_s4   ;;  %s2165_s30 = sphi %s3463_s30, %s1594_s30  }
 0x1f0   : >> { %1581 = vst [vmem:[%s2165_s30] sm:$0xff] %v1580_v11  ;;  %1583 = vst [vmem:[%s2165_s30 + $0x8] sm:$0xff] %v1582_v33  ;;  %v1586_v12 = vld [vmem:[%s2169_s4 + $0x18] sm:$0xff]  ;;  %p1589_p0 = scmp.ge.s32.totalorder %s1588_s6, %s3415_s25  ;;  %p1573_p1 = scmp.ge.s32.totalorder %s1574_s12, %s3415_s25 }
 0x1f1   : >> { %1585 = vst [vmem:[%s2165_s30 + $0x10] sm:$0xff] %v1584_v6  ;;  %1587 = vst [vmem:[%s2165_s30 + $0x18] sm:$0xff] %v1586_v12 }
 0x1f2   : >> { %s3473_s6 = smov (%p1589_p0, %s1588_s6), 0  ;;  %1576 = sbr.rel (!%p1573_p1) target bundleno = 495 (0x1ef), region = 105 }
 0x1f3   : >> { %s1735_s7 = sshll.u32 %s3473_s6, 5  ;;  %s2172_s5 = smov %s3473_s6  }
 0x1f4   : >> { %s1593_s4 = scalar_lea.vmem %s3419_s27, %s1735_s7 [#allocation2]   ;;  %s1594_s30 = scalar_lea.vmem %s3422_s29, %s1735_s7  }
 0x1f9 PF: > { %p10_p2 = scmp.ge.s32.totalorder %s2215_s16, 4   ;;  %s3465_s12 = smov %s2141_s13 }
 0x1fa   : > { %s3466_s13 = smov %s2223_s19  ;;  %s3467_s14 = smov %s2215_s16 }
 0x1fb   :  { %12 = sbr.rel (!%p10_p2) target bundleno = 2 (0x2), region = 116 }

</bundles_post_ra>
